<compile_context>
chip_gen: v6e
topology: v6e:2x2x1
jax: 0.10.0
libtpu: 0.0.40
codegen_flags: <defaults>
</compile_context>

<pallas_src>
import jax
import jax.numpy as jnp
from jax.experimental import pallas as pl
from jax.experimental.pallas import tpu as pltpu


def lrb_kernel(x_ref, w_ref, b_ref, o_ref):
    # x_ref: (1, C, TD, HW)  w_ref: (Cout, C)  b_ref: (Cout, 1)  o_ref: (1, Cout, TD)
    x = x_ref[0]                                  # (C, TD, HW)
    pooled = jnp.mean(x, axis=-1)                 # (C, TD)  == adaptive_avg_pool3d -> (D,1,1)
    o_ref[0] = (
        jnp.dot(w_ref[...], pooled, preferred_element_type=jnp.float32)  # (Cout, TD)
        + b_ref[...]                              # broadcast (Cout, 1)
    )


def _pick_d_tile(C, D, HW, itemsize=4, budget_bytes=8 << 20):
    """Only tile D when a full-D x-block would exceed a conservative VMEM
    budget (sized for v7x's smaller VMEM, double-buffered) AND D can be split
    into 128-multiples (keeps the x-block sublane dim and the output lane dim
    legal under the (8, 128) layout rules). Otherwise take the full D extent."""
    if C * D * HW * itemsize <= budget_bytes or D % 128 != 0:
        return D
    td = D
    while td > 128 and (C * td * HW * itemsize > budget_bytes or D % td != 0):
        td -= 128
    return td


def lrb_forward(inputs, weight, bias):
    """inputs: (N, 290, D, H, W) float32 (PyTorch NCDHW).
    weight: (12, 290) (squeezed Conv3d 1x1x1 weight). bias: (12,)."""
    N, C, D, H, W = inputs.shape
    Cout = weight.shape[0]
    HW = H * W

    # Free contiguous view — no transpose, no extra HBM pass.
    x = inputs.reshape(N, C, D, HW)
    b2 = bias.reshape(Cout, 1)

    TD = _pick_d_tile(C, D, HW)
    grid = (N, D // TD)

    out = pl.pallas_call(
        lrb_kernel,
        out_shape=jax.ShapeDtypeStruct((N, Cout, D), jnp.float32),
        grid=grid,
        in_specs=[
            pl.BlockSpec((1, C, TD, HW), lambda n, d: (n, 0, d, 0)),
            pl.BlockSpec((Cout, C), lambda n, d: (0, 0)),
            pl.BlockSpec((Cout, 1), lambda n, d: (0, 0)),
        ],
        out_specs=pl.BlockSpec((1, Cout, TD), lambda n, d: (n, 0, d)),
        compiler_params=pltpu.CompilerParams(
            dimension_semantics=("parallel", "parallel"),
            vmem_limit_bytes=32 * 1024 * 1024,
        ),
    )(x, weight, b2)                              # (N, 12, D)

    # Matches PyTorch flatten order of (N, 12, D, 1, 1): free reshape, no transpose.
    return out.reshape(-1, 3, 4)


def reference_forward(inputs, weight, bias):
    # pure-JAX reference of the PyTorch semantics
    pooled = jnp.mean(inputs, axis=(3, 4))                      # (N, C, D)
    conv = jnp.einsum("ncd,oc->nod", pooled, weight) + bias[None, :, None]
    return conv.reshape(-1, 3, 4)


if __name__ == "__main__":
    key = jax.random.PRNGKey(0)
    k_x, k_w, k_b = jax.random.split(key, 3)

    N, C, D, H, W = 2, 290, 2, 4, 4
    Cout = 12

    inputs = jax.random.normal(k_x, (N, C, D, H, W), dtype=jnp.float32)
    # deterministic "Conv3d(290, 12, 1)" params (kaiming-uniform-like scale)
    bound = 1.0 / (C ** 0.5)
    weight = jax.random.uniform(k_w, (Cout, C), jnp.float32, -bound, bound)
    bias = jax.random.uniform(k_b, (Cout,), jnp.float32, -bound, bound)

    out = jax.block_until_ready(lrb_forward(inputs, weight, bias))
    ref = jax.block_until_ready(reference_forward(inputs, weight, bias))

    assert out.shape == (N * D, 3, 4), out.shape
    assert jnp.allclose(out, ref, atol=1e-4, rtol=1e-4), float(jnp.max(jnp.abs(out - ref)))
    print("KERNEL_OK")
</pallas_src>

<mosaic_0001>
module attributes {stable_mosaic.version = 11 : i64} {
  func.func @lrb_kernel(%arg0: i32, %arg1: i32, %arg2: memref<1x290x2x16xf32, #tpu.memory_space<vmem>>, %arg3: memref<12x290xf32, #tpu.memory_space<vmem>>, %arg4: memref<12x1xf32, #tpu.memory_space<vmem>>, %arg5: memref<1x12x2xf32, #tpu.memory_space<vmem>>) attributes {dimension_semantics = [#tpu.dimension_semantics<parallel>, #tpu.dimension_semantics<parallel>], iteration_bounds = array<i64: 2, 1>, scalar_prefetch = 0 : i64, scratch_operands = 0 : i64, tpu.core_type = #tpu.core_type<tc>, window_params = [{transform_indices = @transform_0, window_bounds = array<i64: 1, 290, 2, 16>}, {pipeline_mode = #tpu.pipeline_mode<synchronous>, transform_indices = @transform_1, window_bounds = array<i64: 12, 290>}, {pipeline_mode = #tpu.pipeline_mode<synchronous>, transform_indices = @transform_2, window_bounds = array<i64: 12, 1>}, {transform_indices = @transform_3, window_bounds = array<i64: 1, 12, 2>}]} {
    %c0 = arith.constant 0 : index
    %c0_0 = arith.constant 0 : index
    %c0_1 = arith.constant 0 : index
    %c0_2 = arith.constant 0 : index
    %0 = vector.load %arg2[%c0, %c0_0, %c0_1, %c0_2] : memref<1x290x2x16xf32, #tpu.memory_space<vmem>>, vector<1x290x2x16xf32>
    %1 = vector.shape_cast %0 : vector<1x290x2x16xf32> to vector<290x2x16xf32>
    %cst = arith.constant dense<0.000000e+00> : vector<290x2xf32>
    %2 = vector.multi_reduction <add>, %1, %cst [2] : vector<290x2x16xf32> to vector<290x2xf32>
    %cst_3 = arith.constant 1.600000e+01 : f32
    %3 = vector.broadcast %cst_3 : f32 to vector<290x2xf32>
    %4 = arith.divf %2, %3 : vector<290x2xf32>
    %c0_4 = arith.constant 0 : index
    %c0_5 = arith.constant 0 : index
    %5 = vector.load %arg3[%c0_4, %c0_5] : memref<12x290xf32, #tpu.memory_space<vmem>>, vector<12x290xf32>
    %cst_6 = arith.constant dense<0.000000e+00> : vector<12x2xf32>
    %6 = tpu.matmul %5, %4, %cst_6 {dimension_numbers = #tpu.dot_dimension_numbers<[1], [0], [0], [1], [0, 0, 1, 1], [], []>} : vector<12x290xf32>, vector<290x2xf32>, vector<12x2xf32> -> vector<12x2xf32>
    %c0_7 = arith.constant 0 : index
    %c0_8 = arith.constant 0 : index
    %7 = vector.load %arg4[%c0_7, %c0_8] : memref<12x1xf32, #tpu.memory_space<vmem>>, vector<12x1xf32>
    %8 = vector.broadcast %7 : vector<12x1xf32> to vector<12x2xf32>
    %9 = arith.addf %6, %8 : vector<12x2xf32>
    %c0_9 = arith.constant 0 : index
    %c0_10 = arith.constant 0 : index
    %c0_11 = arith.constant 0 : index
    %10 = vector.load %arg5[%c0_9, %c0_10, %c0_11] : memref<1x12x2xf32, #tpu.memory_space<vmem>>, vector<1x12x2xf32>
    %11 = vector.shape_cast %10 : vector<1x12x2xf32> to vector<12x2xf32>
    %12 = vector.shape_cast %9 : vector<12x2xf32> to vector<1x12x2xf32>
    tpu.vector_store %arg5[%c0_9, %c0_10, %c0_11], %12 {strides = array<i32>} : memref<1x12x2xf32, #tpu.memory_space<vmem>>, vector<1x12x2xf32>,
    return
  }
  func.func @transform_0(%arg0: i32, %arg1: i32) -> (i32, i32, i32, i32) {
    %c0_i32 = arith.constant 0 : i32
    %c0_i32_0 = arith.constant 0 : i32
    %c0_i32_1 = arith.constant 0 : i32
    return %arg0, %c0_i32, %arg1, %c0_i32_0 : i32, i32, i32, i32
  }
  func.func @transform_1(%arg0: i32, %arg1: i32) -> (i32, i32) {
    %c0_i32 = arith.constant 0 : i32
    %c0_i32_0 = arith.constant 0 : i32
    %c0_i32_1 = arith.constant 0 : i32
    return %c0_i32, %c0_i32_0 : i32, i32
  }
  func.func @transform_2(%arg0: i32, %arg1: i32) -> (i32, i32) {
    %c0_i32 = arith.constant 0 : i32
    %c0_i32_0 = arith.constant 0 : i32
    %c0_i32_1 = arith.constant 0 : i32
    return %c0_i32, %c0_i32_0 : i32, i32
  }
  func.func @transform_3(%arg0: i32, %arg1: i32) -> (i32, i32, i32) {
    %c0_i32 = arith.constant 0 : i32
    %c0_i32_0 = arith.constant 0 : i32
    return %arg0, %c0_i32, %arg1 : i32, i32, i32
  }
}

</mosaic_0001>

<bundles_post_ra>
// kernel: tpu_custom_call.1
= control target key start
LH: loop header
LB: loop body
LE: loop exit
PB: predicated region body
PF: predicated region fallthrough
CT: control target
= control target key end

     0   :  { %s3812_s12 = smov 0   ;;  %s3814_s13 = smov 0   ;;  %s5227_s0 = inlined_call_operand.vmem [shape: f32[2,290,2,16], index: 0, kind: input, shape index: {}]   ;;  %s5228_s1 = inlined_call_operand.vmem [shape: f32[12,290], index: 1, kind: input, shape index: {}]   ;;  %s5229_s2 = inlined_call_operand.vmem [shape: f32[12,1], index: 2, kind: input, shape index: {}]   ;;  %s5230_s3 = inlined_call_operand.vmem [shape: f32[2,12,2], index: 3, kind: output, shape index: {}]  }
   0x1   :  { %s3816_s14 = smov 0  }
   0x2 LB: > { %s25_s15 = sadd.s32 1, %s3785_s13  ;;  %p3671_p0 = scmp.ge.s32.totalorder %s3789_s14, 1  ;;  %s3789_s14 = sphi %s3816_s14, %s13_s14   ;;  %s3785_s13 = sphi %s3814_s13, %s5232_s13   ;;  %s3781_s12 = sphi %s3812_s12, %s5231_s12  }
   0x3   : > { %p27_p1 = scmp.ge.s32.totalorder %s25_s15, 2  ;;  %p156_p2 = scmp.lt.s32.totalorder %s3789_s14, 3 }
   0x5   : > { %s5234_s15 = smov (%p27_p1, %s25_s15), 0  ;;  %p157_p3 = pnand %p3671_p0, %p156_p2 }
   0x6   : > { %p186_p4 = scmp.lt.s32.totalorder (!%p157_p3), %s3781_s12, 1 }
   0x7   : > { %160 = sbr.rel (%p157_p3) target bundleno = 938 (0x3aa), region = 32 }
   0xc   : > { %s5236_s12 = smov (!%p186_p4, %s3781_s12), 1  ;;  %vm492_vm0 = vcmask 123904   ;;  %vm3124_vm1 = vcmask 1041409   ;;  %vm3126_vm2 = vcmask 1042434   ;;  %vm3128_vm3 = vcmask 1043459  }
   0xd   : > { %s3739_s16 = smul.u32 580, %s5236_s12  ;;  %vm3130_vm4 = vcmask 1044484   ;;  %vm3132_vm5 = vcmask 1045509   ;;  %vm3134_vm6 = vcmask 1046534   ;;  %vm3136_vm7 = vcmask 1047559   ;;  %s3680_s9 = sshll.u32 %s5236_s12, 4 }
   0xe   : > { %vm3420_vm8 = vcmask 277504   ;;  %vm3427_vm9 = vcmask 1041408   ;;  %vm3582_vm10 = vcmask 11264   ;;  %vm3580_vm11 = vcmask 15360  }
   0xf   : > { %s3836_s19 = scalar_lea.vmem %s5227_s0, %s3739_s16  ;;  %s201_s16 = scalar_lea.vmem %s5230_s3, %s3680_s9 }
  0x10   : > { %v204_v0 = vld [vmem:[%s3836_s19 + $0x4] sm:$0x3]  ;;  %v202_v1 = vld [vmem:[%s3836_s19] sm:$0x3]  ;;  %v205_v2 = vld [vmem:[%s3836_s19 + $0x6] sm:$0x3] }
  0x11   : > { %v499_v3 = vsel %vm492_vm0, %v204_v0, 0.0  ;;  %v493_v4 = vsel %vm492_vm0, %v202_v1, 0.0  ;;  %v203_v5 = vld [vmem:[%s3836_s19 + $0x2] sm:$0x3]  ;;  %v502_v6 = vsel %vm492_vm0, %v205_v2, 0.0 }
  0x12   : > { %500 = vadd.xlane.f32.xlu1 %v499_v3  ;;  %494 = vadd.xlane.f32.xlu0 %v493_v4  ;;  %v496_v7 = vsel %vm492_vm0, %v203_v5, 0.0  ;;  %v207_v8 = vld [vmem:[%s3836_s19 + $0xa] sm:$0x3]  ;;  %v206_v9 = vld [vmem:[%s3836_s19 + $0x8] sm:$0x3] }
  0x13   : > { %v508_v10 = vsel %vm492_vm0, %v207_v8, 0.0  ;;  %v505_v11 = vsel %vm492_vm0, %v206_v9, 0.0  ;;  %v209_v12 = vld [vmem:[%s3836_s19 + $0xe] sm:$0x3]  ;;  %v208_v13 = vld [vmem:[%s3836_s19 + $0xc] sm:$0x3] }
  0x14   : > { %v514_v14 = vsel %vm492_vm0, %v209_v12, 0.0  ;;  %v511_v15 = vsel %vm492_vm0, %v208_v13, 0.0  ;;  %v211_v16 = vld [vmem:[%s3836_s19 + $0x12] sm:$0x3]  ;;  %v210_v17 = vld [vmem:[%s3836_s19 + $0x10] sm:$0x3] }
  0x15   : > { %v520_v18 = vsel %vm492_vm0, %v211_v16, 0.0  ;;  %v517_v19 = vsel %vm492_vm0, %v210_v17, 0.0  ;;  %v213_v20 = vld [vmem:[%s3836_s19 + $0x16] sm:$0x3]  ;;  %v212_v21 = vld [vmem:[%s3836_s19 + $0x14] sm:$0x3] }
  0x16   : > { %503 = vadd.xlane.f32.xlu1 %v502_v6  ;;  %497 = vadd.xlane.f32.xlu0 %v496_v7  ;;  %v526_v22 = vsel %vm492_vm0, %v213_v20, 0.0  ;;  %v523_v23 = vsel %vm492_vm0, %v212_v21, 0.0  ;;  %v215_v24 = vld [vmem:[%s3836_s19 + $0x1a] sm:$0x3]  ;;  %v214_v25 = vld [vmem:[%s3836_s19 + $0x18] sm:$0x3] }
  0x17   : > { %v532_v26 = vsel %vm492_vm0, %v215_v24, 0.0  ;;  %v529_v27 = vsel %vm492_vm0, %v214_v25, 0.0  ;;  %v217_v28 = vld [vmem:[%s3836_s19 + $0x1e] sm:$0x3]  ;;  %v216_v29 = vld [vmem:[%s3836_s19 + $0x1c] sm:$0x3] }
  0x18   : > { %v538_v30 = vsel %vm492_vm0, %v217_v28, 0.0  ;;  %v535_v31 = vsel %vm492_vm0, %v216_v29, 0.0  ;;  %v219_v32 = vld [vmem:[%s3836_s19 + $0x22] sm:$0x3]  ;;  %v218_v33 = vld [vmem:[%s3836_s19 + $0x20] sm:$0x3] }
  0x19   : > { %v544_v34 = vsel %vm492_vm0, %v219_v32, 0.0  ;;  %v541_v35 = vsel %vm492_vm0, %v218_v33, 0.0  ;;  %v221_v36 = vld [vmem:[%s3836_s19 + $0x26] sm:$0x3]  ;;  %v220_v37 = vld [vmem:[%s3836_s19 + $0x24] sm:$0x3] }
  0x1a   : > { %509 = vadd.xlane.f32.xlu1 %v508_v10  ;;  %506 = vadd.xlane.f32.xlu0 %v505_v11  ;;  %v550_v38 = vsel %vm492_vm0, %v221_v36, 0.0  ;;  %v547_v39 = vsel %vm492_vm0, %v220_v37, 0.0  ;;  %v223_v40 = vld [vmem:[%s3836_s19 + $0x2a] sm:$0x3]  ;;  %v222_v41 = vld [vmem:[%s3836_s19 + $0x28] sm:$0x3] }
  0x1b   : > { %v556_v42 = vsel %vm492_vm0, %v223_v40, 0.0  ;;  %v553_v43 = vsel %vm492_vm0, %v222_v41, 0.0  ;;  %v225_v44 = vld [vmem:[%s3836_s19 + $0x2e] sm:$0x3]  ;;  %v224_v45 = vld [vmem:[%s3836_s19 + $0x2c] sm:$0x3] }
  0x1c   : > { %v562_v46 = vsel %vm492_vm0, %v225_v44, 0.0  ;;  %v559_v47 = vsel %vm492_vm0, %v224_v45, 0.0  ;;  %v227_v48 = vld [vmem:[%s3836_s19 + $0x32] sm:$0x3]  ;;  %v226_v49 = vld [vmem:[%s3836_s19 + $0x30] sm:$0x3] }
  0x1d   : > { %v568_v50 = vsel %vm492_vm0, %v227_v48, 0.0  ;;  %v565_v51 = vsel %vm492_vm0, %v226_v49, 0.0  ;;  %v229_v52 = vld [vmem:[%s3836_s19 + $0x36] sm:$0x3]  ;;  %v228_v53 = vld [vmem:[%s3836_s19 + $0x34] sm:$0x3] }
  0x1e   : > { %515 = vadd.xlane.f32.xlu1 %v514_v14  ;;  %512 = vadd.xlane.f32.xlu0 %v511_v15  ;;  %v574_v54 = vsel %vm492_vm0, %v229_v52, 0.0  ;;  %v571_v55 = vsel %vm492_vm0, %v228_v53, 0.0  ;;  %v231_v56 = vld [vmem:[%s3836_s19 + $0x3a] sm:$0x3]  ;;  %v230_v57 = vld [vmem:[%s3836_s19 + $0x38] sm:$0x3] }
  0x1f   : > { %v580_v58 = vsel %vm492_vm0, %v231_v56, 0.0  ;;  %v577_v59 = vsel %vm492_vm0, %v230_v57, 0.0  ;;  %v233_v60 = vld [vmem:[%s3836_s19 + $0x3e] sm:$0x3]  ;;  %v232_v61 = vld [vmem:[%s3836_s19 + $0x3c] sm:$0x3] }
  0x20   : > { %v586_v62 = vsel %vm492_vm0, %v233_v60, 0.0  ;;  %v583_v63 = vsel %vm492_vm0, %v232_v61, 0.0  ;;  %v235_v0 = vld [vmem:[%s3836_s19 + $0x42] sm:$0x3]  ;;  %v234_v1 = vld [vmem:[%s3836_s19 + $0x40] sm:$0x3] }
  0x21   : > { %v592_v2 = vsel %vm492_vm0, %v235_v0, 0.0  ;;  %v589_v3 = vsel %vm492_vm0, %v234_v1, 0.0  ;;  %v237_v4 = vld [vmem:[%s3836_s19 + $0x46] sm:$0x3]  ;;  %v236_v5 = vld [vmem:[%s3836_s19 + $0x44] sm:$0x3] }
  0x22   : > { %521 = vadd.xlane.f32.xlu1 %v520_v18  ;;  %518 = vadd.xlane.f32.xlu0 %v517_v19  ;;  %v598_v6 = vsel %vm492_vm0, %v237_v4, 0.0  ;;  %v595_v7 = vsel %vm492_vm0, %v236_v5, 0.0  ;;  %v239_v8 = vld [vmem:[%s3836_s19 + $0x4a] sm:$0x3]  ;;  %v238_v9 = vld [vmem:[%s3836_s19 + $0x48] sm:$0x3] }
  0x23   : > { %v604_v10 = vsel %vm492_vm0, %v239_v8, 0.0  ;;  %v601_v11 = vsel %vm492_vm0, %v238_v9, 0.0  ;;  %v241_v12 = vld [vmem:[%s3836_s19 + $0x4e] sm:$0x3]  ;;  %v240_v13 = vld [vmem:[%s3836_s19 + $0x4c] sm:$0x3] }
  0x24   : > { %v610_v14 = vsel %vm492_vm0, %v241_v12, 0.0  ;;  %v607_v15 = vsel %vm492_vm0, %v240_v13, 0.0  ;;  %v243_v16 = vld [vmem:[%s3836_s19 + $0x52] sm:$0x3]  ;;  %v242_v17 = vld [vmem:[%s3836_s19 + $0x50] sm:$0x3] }
  0x25   : > { %v616_v18 = vsel %vm492_vm0, %v243_v16, 0.0  ;;  %v613_v19 = vsel %vm492_vm0, %v242_v17, 0.0  ;;  %v245_v20 = vld [vmem:[%s3836_s19 + $0x56] sm:$0x3]  ;;  %v244_v21 = vld [vmem:[%s3836_s19 + $0x54] sm:$0x3] }
  0x26   : > { %527 = vadd.xlane.f32.xlu1 %v526_v22  ;;  %524 = vadd.xlane.f32.xlu0 %v523_v23  ;;  %v622_v22 = vsel %vm492_vm0, %v245_v20, 0.0  ;;  %v619_v23 = vsel %vm492_vm0, %v244_v21, 0.0  ;;  %v247_v24 = vld [vmem:[%s3836_s19 + $0x5a] sm:$0x3]  ;;  %v246_v25 = vld [vmem:[%s3836_s19 + $0x58] sm:$0x3] }
  0x27   : > { %v249_v28 = vld [vmem:[%s3836_s19 + $0x5e] sm:$0x3]  ;;  %v248_v29 = vld [vmem:[%s3836_s19 + $0x5c] sm:$0x3]  ;;  %v251_v32 = vld [vmem:[%s3836_s19 + $0x62] sm:$0x3] }
  0x28   : > { %v250_v33 = vld [vmem:[%s3836_s19 + $0x60] sm:$0x3]  ;;  %v253_v36 = vld [vmem:[%s3836_s19 + $0x66] sm:$0x3]  ;;  %v252_v37 = vld [vmem:[%s3836_s19 + $0x64] sm:$0x3] }
  0x29   : > { %v255_v40 = vld [vmem:[%s3836_s19 + $0x6a] sm:$0x3]  ;;  %v254_v41 = vld [vmem:[%s3836_s19 + $0x68] sm:$0x3]  ;;  %v257_v44 = vld [vmem:[%s3836_s19 + $0x6e] sm:$0x3] }
  0x2a   : > { %533 = vadd.xlane.f32.xlu1 %v532_v26  ;;  %530 = vadd.xlane.f32.xlu0 %v529_v27  ;;  %v628_v26 = vsel %vm492_vm0, %v247_v24, 0.0  ;;  %v625_v27 = vsel %vm492_vm0, %v246_v25, 0.0  ;;  %v256_v45 = vld [vmem:[%s3836_s19 + $0x6c] sm:$0x3]  ;;  %v259_v48 = vld [vmem:[%s3836_s19 + $0x72] sm:$0x3] }
  0x2b   : > { %v258_v49 = vld [vmem:[%s3836_s19 + $0x70] sm:$0x3]  ;;  %v261_v52 = vld [vmem:[%s3836_s19 + $0x76] sm:$0x3]  ;;  %v260_v53 = vld [vmem:[%s3836_s19 + $0x74] sm:$0x3] }
  0x2c   : > { %v263_v56 = vld [vmem:[%s3836_s19 + $0x7a] sm:$0x3]  ;;  %v262_v57 = vld [vmem:[%s3836_s19 + $0x78] sm:$0x3]  ;;  %v265_v60 = vld [vmem:[%s3836_s19 + $0x7e] sm:$0x3] }
  0x2d   : > { %v264_v61 = vld [vmem:[%s3836_s19 + $0x7c] sm:$0x3]  ;;  %v267_v0 = vld [vmem:[%s3836_s19 + $0x82] sm:$0x3]  ;;  %v266_v1 = vld [vmem:[%s3836_s19 + $0x80] sm:$0x3] }
  0x2e   : > { %539 = vadd.xlane.f32.xlu1 %v538_v30  ;;  %536 = vadd.xlane.f32.xlu0 %v535_v31  ;;  %v634_v30 = vsel %vm492_vm0, %v249_v28, 0.0  ;;  %v631_v31 = vsel %vm492_vm0, %v248_v29, 0.0  ;;  %v269_v4 = vld [vmem:[%s3836_s19 + $0x86] sm:$0x3]  ;;  %v268_v5 = vld [vmem:[%s3836_s19 + $0x84] sm:$0x3] }
  0x2f   : > { %v271_v8 = vld [vmem:[%s3836_s19 + $0x8a] sm:$0x3]  ;;  %v270_v9 = vld [vmem:[%s3836_s19 + $0x88] sm:$0x3]  ;;  %v273_v13 = vld [vmem:[%s3836_s19 + $0x8e] sm:$0x3] }
  0x30   : > { %v697_v12 = vsel %vm492_vm0, %v270_v9, 0.0  ;;  %v275_v21 = vld [vmem:[%s3836_s19 + $0x92] sm:$0x3] }
  0x31   : > { %v712_v28 = vsel %vm492_vm0, %v275_v21, 0.0 }
  0x32   : > { %545 = vadd.xlane.f32.xlu1 %v544_v34  ;;  %542 = vadd.xlane.f32.xlu0 %v541_v35  ;;  %v640_v34 = vsel %vm492_vm0, %v251_v32, 0.0  ;;  %v637_v35 = vsel %vm492_vm0, %v250_v33, 0.0  ;;  %v277_v32 = vld [vmem:[%s3836_s19 + $0x96] sm:$0x3]  ;;  %v276_v33 = vld [vmem:[%s3836_s19 + $0x94] sm:$0x3] }
  0x36   : > { %551 = vadd.xlane.f32.xlu1 %v550_v38  ;;  %548 = vadd.xlane.f32.xlu0 %v547_v39  ;;  %v646_v38 = vsel %vm492_vm0, %v253_v36, 0.0  ;;  %v643_v39 = vsel %vm492_vm0, %v252_v37, 0.0 }
  0x3a   : > { %557 = vadd.xlane.f32.xlu1 %v556_v42  ;;  %554 = vadd.xlane.f32.xlu0 %v553_v43  ;;  %v652_v42 = vsel %vm492_vm0, %v255_v40, 0.0  ;;  %v649_v43 = vsel %vm492_vm0, %v254_v41, 0.0  ;;  %v718_v40 = vsel %vm492_vm0, %v277_v32, 0.0  ;;  %v715_v41 = vsel %vm492_vm0, %v276_v33, 0.0 }
  0x3e   : > { %563 = vadd.xlane.f32.xlu1 %v562_v46  ;;  %560 = vadd.xlane.f32.xlu0 %v559_v47  ;;  %v658_v46 = vsel %vm492_vm0, %v257_v44, 0.0  ;;  %v655_v47 = vsel %vm492_vm0, %v256_v45, 0.0  ;;  %v279_v45 = vld [vmem:[%s3836_s19 + $0x9a] sm:$0x3] }
  0x42   : > { %569 = vadd.xlane.f32.xlu1 %v568_v50  ;;  %566 = vadd.xlane.f32.xlu0 %v565_v51  ;;  %v664_v50 = vsel %vm492_vm0, %v259_v48, 0.0  ;;  %v661_v51 = vsel %vm492_vm0, %v258_v49, 0.0 }
  0x46   : > { %575 = vadd.xlane.f32.xlu1 %v574_v54  ;;  %572 = vadd.xlane.f32.xlu0 %v571_v55  ;;  %v670_v54 = vsel %vm492_vm0, %v261_v52, 0.0  ;;  %v667_v55 = vsel %vm492_vm0, %v260_v53, 0.0  ;;  %v724_v53 = vsel %vm492_vm0, %v279_v45, 0.0 }
  0x4a   : > { %581 = vadd.xlane.f32.xlu1 %v580_v58  ;;  %578 = vadd.xlane.f32.xlu0 %v577_v59  ;;  %v676_v58 = vsel %vm492_vm0, %v263_v56, 0.0  ;;  %v673_v59 = vsel %vm492_vm0, %v262_v57, 0.0 }
  0x4e   : > { %587 = vadd.xlane.f32.xlu1 %v586_v62  ;;  %584 = vadd.xlane.f32.xlu0 %v583_v63  ;;  %v682_v62 = vsel %vm492_vm0, %v265_v60, 0.0  ;;  %v679_v63 = vsel %vm492_vm0, %v264_v61, 0.0 }
  0x52   : > { %593 = vadd.xlane.f32.xlu1 %v592_v2  ;;  %590 = vadd.xlane.f32.xlu0 %v589_v3  ;;  %v688_v2 = vsel %vm492_vm0, %v267_v0, 0.0  ;;  %v685_v3 = vsel %vm492_vm0, %v266_v1, 0.0 }
  0x56   : > { %599 = vadd.xlane.f32.xlu1 %v598_v6  ;;  %596 = vadd.xlane.f32.xlu0 %v595_v7  ;;  %v694_v6 = vsel %vm492_vm0, %v269_v4, 0.0  ;;  %v691_v7 = vsel %vm492_vm0, %v268_v5, 0.0  ;;  %v283_v5 = vld [vmem:[%s3836_s19 + $0xa2] sm:$0x3] }
  0x5a   : > { %605 = vadd.xlane.f32.xlu1 %v604_v10  ;;  %602 = vadd.xlane.f32.xlu0 %v601_v11  ;;  %v1962_v10 = vlaneseq  ;;  %v700_v11 = vsel %vm492_vm0, %v271_v8, 0.0 }
  0x5c   : > { %v1965_v16 = vshrl.u32 %v1962_v10, 7 }
  0x5e   : > { %611 = vadd.xlane.f32.xlu1 %v610_v14  ;;  %608 = vadd.xlane.f32.xlu0 %v607_v15  ;;  %v272_v14 = vld [vmem:[%s3836_s19 + $0x8c] sm:$0x3]  ;;  %v1963_v15 = vand.u32 127, %v1962_v10 }
  0x5f   : > { %v703_v20 = vsel %vm492_vm0, %v272_v14, 0.0 }
  0x62   : > { %617 = vadd.xlane.f32.xlu1 %v616_v18  ;;  %614 = vadd.xlane.f32.xlu0 %v613_v19  ;;  %v706_v19 = vsel %vm492_vm0, %v273_v13, 0.0  ;;  %v736_v13 = vsel %vm492_vm0, %v283_v5, 0.0 }
  0x66   : > { %623 = vadd.xlane.f32.xlu1 %v622_v22  ;;  %620 = vadd.xlane.f32.xlu0 %v619_v23  ;;  %v274_v22 = vld [vmem:[%s3836_s19 + $0x90] sm:$0x3]  ;;  %v3984_v23 = vsub.s32 %v1963_v15, %v1965_v16 }
  0x67   : > { %v709_v29 = vsel %vm492_vm0, %v274_v22, 0.0 }
  0x6a   : > { %629 = vadd.xlane.f32.xlu1 %v628_v26  ;;  %626 = vadd.xlane.f32.xlu0 %v625_v27 }
  0x6e   : > { %635 = vadd.xlane.f32.xlu1 %v634_v30  ;;  %632 = vadd.xlane.f32.xlu0 %v631_v31 }
  0x72   : > { %641 = vadd.xlane.f32.xlu1 %v640_v34  ;;  %638 = vadd.xlane.f32.xlu0 %v637_v35 }
  0x76   : > { %647 = vadd.xlane.f32.xlu1 %v646_v38  ;;  %644 = vadd.xlane.f32.xlu0 %v643_v39 }
  0x7a   : > { %653 = vadd.xlane.f32.xlu1 %v652_v42  ;;  %650 = vadd.xlane.f32.xlu0 %v649_v43 }
  0x7e   : > { %659 = vadd.xlane.f32.xlu1 %v658_v46  ;;  %656 = vadd.xlane.f32.xlu0 %v655_v47  ;;  %v278_v46 = vld [vmem:[%s3836_s19 + $0x98] sm:$0x3] }
  0x82   : > { %665 = vadd.xlane.f32.xlu1 %v664_v50  ;;  %662 = vadd.xlane.f32.xlu0 %v661_v51 }
  0x86   : > { %671 = vadd.xlane.f32.xlu1 %v670_v54  ;;  %668 = vadd.xlane.f32.xlu0 %v667_v55  ;;  %v721_v54 = vsel %vm492_vm0, %v278_v46, 0.0 }
  0x8a   : > { %677 = vadd.xlane.f32.xlu1 %v676_v58  ;;  %674 = vadd.xlane.f32.xlu0 %v673_v59  ;;  %v281_v58 = vld [vmem:[%s3836_s19 + $0x9e] sm:$0x3]  ;;  %v280_v59 = vld [vmem:[%s3836_s19 + $0x9c] sm:$0x3] }
  0x8b   : > { %v730_v1 = vsel %vm492_vm0, %v281_v58, 0.0 }
  0x8e   : > { %683 = vadd.xlane.f32.xlu1 %v682_v62  ;;  %680 = vadd.xlane.f32.xlu0 %v679_v63 }
  0x92   : > { %689 = vadd.xlane.f32.xlu1 %v688_v2  ;;  %686 = vadd.xlane.f32.xlu0 %v685_v3  ;;  %v727_v2 = vsel %vm492_vm0, %v280_v59, 0.0 }
  0x96   : > { %695 = vadd.xlane.f32.xlu1 %v694_v6  ;;  %692 = vadd.xlane.f32.xlu0 %v691_v7  ;;  %v282_v6 = vld [vmem:[%s3836_s19 + $0xa0] sm:$0x3] }
  0x97   : > { %v733_v14 = vsel %vm492_vm0, %v282_v6, 0.0 }
  0x9a   : > { %701 = vadd.xlane.f32.xlu1 %v700_v11  ;;  %698 = vadd.xlane.f32.xlu0 %v697_v12 }
  0x9b   : > { %v501_v17 = vpop.xlane.xlu1 %500  ;;  %v495_v18 = vpop.xlane.xlu0 %494 }
  0x9c   : > { %v1364_v24 = vmul.f32 0.0625, %v495_v18  ;;  %v1366_v25 = vmul.f32 0.0625, %v501_v17  ;;  %v285_v18 = vld [vmem:[%s3836_s19 + $0xa6] sm:$0x3] }
  0x9e   : > { %707 = vadd.xlane.f32.xlu1 %v706_v19  ;;  %704 = vadd.xlane.f32.xlu0 %v703_v20  ;;  %v1967_v34 = vrot.slane %v1364_v24, %v3984_v23  ;;  %v1975_v37 = vrot.slane %v1366_v25, %v3984_v23  ;;  %v284_v19 = vld [vmem:[%s3836_s19 + $0xa4] sm:$0x3]  ;;  %v742_v25 = vsel %vm492_vm0, %v285_v18, 0.0 }
  0x9f   : > { %v504_v26 = vpop.xlane.xlu1 %503  ;;  %v498_v27 = vpop.xlane.xlu0 %497 }
  0xa0   : > { %v1367_v30 = vmul.f32 0.0625, %v504_v26  ;;  %v1365_v31 = vmul.f32 0.0625, %v498_v27  ;;  %v739_v26 = vsel %vm492_vm0, %v284_v19, 0.0 }
  0xa2   : > { %v1979_v35 = vrot.slane %v1367_v30, %v3984_v23  ;;  %v1971_v36 = vrot.slane %v1365_v31, %v3984_v23  ;;  %713 = vadd.xlane.f32.xlu1 %v712_v28  ;;  %710 = vadd.xlane.f32.xlu0 %v709_v29  ;;  %v287_v30 = vld [vmem:[%s3836_s19 + $0xaa] sm:$0x3]  ;;  %v286_v31 = vld [vmem:[%s3836_s19 + $0xa8] sm:$0x3] }
  0xa3   : > { %v510_v38 = vpop.xlane.xlu1 %509  ;;  %v507_v39 = vpop.xlane.xlu0 %506 }
  0xa4   : > { %v3125_v42 = vsel %vm3124_vm1, %v1971_v36, %v1967_v34  ;;  %v1369_v43 = vmul.f32 0.0625, %v510_v38  ;;  %v1368_v44 = vmul.f32 0.0625, %v507_v39  ;;  %v745_v38 = vsel %vm492_vm0, %v286_v31, 0.0 }
  0xa5   : > { %v3127_v47 = vsel %vm3126_vm2, %v1975_v37, %v3125_v42  ;;  %v748_v37 = vsel %vm492_vm0, %v287_v30, 0.0  ;;  %v289_v42 = vld [vmem:[%s3836_s19 + $0xae] sm:$0x3] }
  0xa6   : > { %v1987_v48 = vrot.slane %v1369_v43, %v3984_v23  ;;  %v3129_v49 = vsel %vm3128_vm3, %v1979_v35, %v3127_v47  ;;  %v1983_v50 = vrot.slane %v1368_v44, %v3984_v23  ;;  %719 = vadd.xlane.f32.xlu1 %v718_v40  ;;  %716 = vadd.xlane.f32.xlu0 %v715_v41  ;;  %v288_v43 = vld [vmem:[%s3836_s19 + $0xac] sm:$0x3] }
  0xa7   : > { %v516_v51 = vpop.xlane.xlu1 %515  ;;  %v513_v52 = vpop.xlane.xlu0 %512 }
  0xa8   : > { %v3131_v55 = vsel %vm3130_vm4, %v1983_v50, %v3129_v49  ;;  %v1371_v56 = vmul.f32 0.0625, %v516_v51  ;;  %v1370_v57 = vmul.f32 0.0625, %v513_v52  ;;  %v754_v49 = vsel %vm492_vm0, %v289_v42, 0.0 }
  0xa9   : > { %v3133_v60 = vsel %vm3132_vm5, %v1987_v48, %v3131_v55  ;;  %v751_v50 = vsel %vm492_vm0, %v288_v43, 0.0 }
  0xaa   : > { %v1995_v61 = vrot.slane %v1371_v56, %v3984_v23  ;;  %v1991_v62 = vrot.slane %v1370_v57, %v3984_v23  ;;  %725 = vadd.xlane.f32.xlu1 %v724_v53  ;;  %722 = vadd.xlane.f32.xlu0 %v721_v54  ;;  %v291_v53 = vld [vmem:[%s3836_s19 + $0xb2] sm:$0x3]  ;;  %v290_v54 = vld [vmem:[%s3836_s19 + $0xb0] sm:$0x3] }
  0xab   : > { %v522_v63 = vpop.xlane.xlu1 %521  ;;  %v519_v0 = vpop.xlane.xlu0 %518 }
  0xac   : > { %v1373_v3 = vmul.f32 0.0625, %v522_v63  ;;  %v1372_v4 = vmul.f32 0.0625, %v519_v0  ;;  %v3135_v7 = vsel %vm3134_vm6, %v1991_v62, %v3133_v60  ;;  %v757_v62 = vsel %vm492_vm0, %v290_v54, 0.0 }
  0xad   : > { %v4017_v8 = vsel %vm3136_vm7, %v1995_v61, %v3135_v7  ;;  %v760_v61 = vsel %vm492_vm0, %v291_v53, 0.0 }
  0xae   : > { %v2003_v9 = vrot.slane %v1373_v3, %v3984_v23  ;;  %v1999_v10 = vrot.slane %v1372_v4, %v3984_v23  ;;  %731 = vadd.xlane.f32.xlu1 %v730_v1  ;;  %728 = vadd.xlane.f32.xlu0 %v727_v2  ;;  %v293_v2 = vld [vmem:[%s3836_s19 + $0xb6] sm:$0x3]  ;;  %v292_v3 = vld [vmem:[%s3836_s19 + $0xb4] sm:$0x3] }
  0xaf   : > { %v528_v11 = vpop.xlane.xlu1 %527  ;;  %v525_v12 = vpop.xlane.xlu0 %524 }
  0xb0   : > { %v3138_v15 = vsel %vm3124_vm1, %v2003_v9, %v1999_v10  ;;  %v1375_v16 = vmul.f32 0.0625, %v528_v11  ;;  %v1374_v17 = vmul.f32 0.0625, %v525_v12  ;;  %v766_v9 = vsel %vm492_vm0, %v293_v2, 0.0 }
  0xb1   : > { %v763_v10 = vsel %vm492_vm0, %v292_v3, 0.0 }
  0xb2   : > { %v2011_v20 = vrot.slane %v1375_v16, %v3984_v23  ;;  %v2007_v21 = vrot.slane %v1374_v17, %v3984_v23  ;;  %737 = vadd.xlane.f32.xlu1 %v736_v13  ;;  %734 = vadd.xlane.f32.xlu0 %v733_v14  ;;  %v295_v14 = vld [vmem:[%s3836_s19 + $0xba] sm:$0x3] }
  0xb3   : > { %v534_v22 = vpop.xlane.xlu1 %533  ;;  %v531_v24 = vpop.xlane.xlu0 %530 }
  0xb4   : > { %v3139_v27 = vsel %vm3126_vm2, %v2007_v21, %v3138_v15  ;;  %v1377_v28 = vmul.f32 0.0625, %v534_v22  ;;  %v1376_v29 = vmul.f32 0.0625, %v531_v24  ;;  %v294_v15 = vld [vmem:[%s3836_s19 + $0xb8] sm:$0x3]  ;;  %v772_v21 = vsel %vm492_vm0, %v295_v14, 0.0 }
  0xb5   : > { %v3140_v32 = vsel %vm3128_vm3, %v2011_v20, %v3139_v27  ;;  %v769_v22 = vsel %vm492_vm0, %v294_v15, 0.0  ;;  %v297_v27 = vld [vmem:[%s3836_s19 + $0xbe] sm:$0x3] }
  0xb6   : > { %v2019_v33 = vrot.slane %v1377_v28, %v3984_v23  ;;  %v2015_v34 = vrot.slane %v1376_v29, %v3984_v23  ;;  %743 = vadd.xlane.f32.xlu1 %v742_v25  ;;  %740 = vadd.xlane.f32.xlu0 %v739_v26  ;;  %v296_v28 = vld [vmem:[%s3836_s19 + $0xbc] sm:$0x3] }
  0xb7   : > { %v540_v35 = vpop.xlane.xlu1 %539  ;;  %v537_v36 = vpop.xlane.xlu0 %536 }
  0xb8   : > { %v3141_v39 = vsel %vm3130_vm4, %v2015_v34, %v3140_v32  ;;  %v1379_v40 = vmul.f32 0.0625, %v540_v35  ;;  %v1378_v41 = vmul.f32 0.0625, %v537_v36  ;;  %v778_v34 = vsel %vm492_vm0, %v297_v27, 0.0 }
  0xb9   : > { %v3142_v44 = vsel %vm3132_vm5, %v2019_v33, %v3141_v39  ;;  %v775_v35 = vsel %vm492_vm0, %v296_v28, 0.0  ;;  %v298_v39 = vld [vmem:[%s3836_s19 + $0xc0] sm:$0x3] }
  0xba   : > { %v2027_v45 = vrot.slane %v1379_v40, %v3984_v23  ;;  %v2023_v46 = vrot.slane %v1378_v41, %v3984_v23  ;;  %749 = vadd.xlane.f32.xlu1 %v748_v37  ;;  %746 = vadd.xlane.f32.xlu0 %v745_v38  ;;  %v299_v38 = vld [vmem:[%s3836_s19 + $0xc2] sm:$0x3] }
  0xbb   : > { %v546_v47 = vpop.xlane.xlu1 %545  ;;  %v543_v48 = vpop.xlane.xlu0 %542 }
  0xbc   : > { %v1381_v51 = vmul.f32 0.0625, %v546_v47  ;;  %v1380_v52 = vmul.f32 0.0625, %v543_v48  ;;  %v3143_v55 = vsel %vm3134_vm6, %v2023_v46, %v3142_v44  ;;  %v784_v46 = vsel %vm492_vm0, %v299_v38, 0.0  ;;  %v308_v38 = vld [vmem:[%s3836_s19 + $0xd4] sm:$0x3] }
  0xbd   : > { %v4050_v56 = vsel %vm3136_vm7, %v2027_v45, %v3143_v55  ;;  %v781_v47 = vsel %vm492_vm0, %v298_v39, 0.0 }
  0xbe   : > { %v2035_v57 = vrot.slane %v1381_v51, %v3984_v23  ;;  %v2031_v58 = vrot.slane %v1380_v52, %v3984_v23  ;;  %755 = vadd.xlane.f32.xlu1 %v754_v49  ;;  %752 = vadd.xlane.f32.xlu0 %v751_v50  ;;  %v301_v51 = vld [vmem:[%s3836_s19 + $0xc6] sm:$0x3]  ;;  %v300_v52 = vld [vmem:[%s3836_s19 + $0xc4] sm:$0x3] }
  0xbf   : > { %v552_v59 = vpop.xlane.xlu1 %551  ;;  %v549_v60 = vpop.xlane.xlu0 %548 }
  0xc0   : > { %v3145_v63 = vsel %vm3124_vm1, %v2035_v57, %v2031_v58  ;;  %v1383_v0 = vmul.f32 0.0625, %v552_v59  ;;  %v1382_v1 = vmul.f32 0.0625, %v549_v60  ;;  %v790_v58 = vsel %vm492_vm0, %v301_v51, 0.0 }
  0xc1   : > { %v787_v59 = vsel %vm492_vm0, %v300_v52, 0.0 }
  0xc2   : > { %v2043_v4 = vrot.slane %v1383_v0, %v3984_v23  ;;  %v2039_v5 = vrot.slane %v1382_v1, %v3984_v23  ;;  %761 = vadd.xlane.f32.xlu1 %v760_v61  ;;  %758 = vadd.xlane.f32.xlu0 %v757_v62  ;;  %v302_v0 = vld [vmem:[%s3836_s19 + $0xc8] sm:$0x3] }
  0xc3   : > { %v558_v6 = vpop.xlane.xlu1 %557  ;;  %v555_v7 = vpop.xlane.xlu0 %554 }
  0xc4   : > { %v3146_v11 = vsel %vm3126_vm2, %v2039_v5, %v3145_v63  ;;  %v1385_v12 = vmul.f32 0.0625, %v558_v6  ;;  %v1384_v13 = vmul.f32 0.0625, %v555_v7  ;;  %v303_v63 = vld [vmem:[%s3836_s19 + $0xca] sm:$0x3]  ;;  %v793_v7 = vsel %vm492_vm0, %v302_v0, 0.0 }
  0xc5   : > { %v3147_v16 = vsel %vm3128_vm3, %v2043_v4, %v3146_v11  ;;  %v796_v6 = vsel %vm492_vm0, %v303_v63, 0.0  ;;  %v312_v63 = vld [vmem:[%s3836_s19 + $0xdc] sm:$0x3] }
  0xc6   : > { %v2051_v17 = vrot.slane %v1385_v12, %v3984_v23  ;;  %v2047_v18 = vrot.slane %v1384_v13, %v3984_v23  ;;  %767 = vadd.xlane.f32.xlu1 %v766_v9  ;;  %764 = vadd.xlane.f32.xlu0 %v763_v10  ;;  %v305_v12 = vld [vmem:[%s3836_s19 + $0xce] sm:$0x3]  ;;  %v304_v13 = vld [vmem:[%s3836_s19 + $0xcc] sm:$0x3] }
  0xc7   : > { %v564_v19 = vpop.xlane.xlu1 %563  ;;  %v561_v20 = vpop.xlane.xlu0 %560 }
  0xc8   : > { %v3148_v24 = vsel %vm3130_vm4, %v2047_v18, %v3147_v16  ;;  %v1387_v25 = vmul.f32 0.0625, %v564_v19  ;;  %v1386_v26 = vmul.f32 0.0625, %v561_v20  ;;  %v802_v19 = vsel %vm492_vm0, %v305_v12, 0.0 }
  0xc9   : > { %v3149_v29 = vsel %vm3132_vm5, %v2051_v17, %v3148_v24  ;;  %v799_v20 = vsel %vm492_vm0, %v304_v13, 0.0  ;;  %v307_v24 = vld [vmem:[%s3836_s19 + $0xd2] sm:$0x3] }
  0xca   : > { %v2059_v30 = vrot.slane %v1387_v25, %v3984_v23  ;;  %v2055_v31 = vrot.slane %v1386_v26, %v3984_v23  ;;  %773 = vadd.xlane.f32.xlu1 %v772_v21  ;;  %770 = vadd.xlane.f32.xlu0 %v769_v22  ;;  %v306_v25 = vld [vmem:[%s3836_s19 + $0xd0] sm:$0x3] }
  0xcb   : > { %v570_v32 = vpop.xlane.xlu1 %569  ;;  %v567_v33 = vpop.xlane.xlu0 %566 }
  0xcc   : > { %v1389_v36 = vmul.f32 0.0625, %v570_v32  ;;  %v1388_v37 = vmul.f32 0.0625, %v567_v33  ;;  %v3150_v40 = vsel %vm3134_vm6, %v2055_v31, %v3149_v29  ;;  %v808_v32 = vsel %vm492_vm0, %v307_v24, 0.0  ;;  %v317_v24 = vld [vmem:[%s3836_s19 + $0xe6] sm:$0x3] }
  0xcd   : > { %v4083_v41 = vsel %vm3136_vm7, %v2059_v30, %v3150_v40  ;;  %v805_v33 = vsel %vm492_vm0, %v306_v25, 0.0  ;;  %v316_v25 = vld [vmem:[%s3836_s19 + $0xe4] sm:$0x3] }
  0xce   : > { %v2067_v42 = vrot.slane %v1389_v36, %v3984_v23  ;;  %v2063_v43 = vrot.slane %v1388_v37, %v3984_v23  ;;  %779 = vadd.xlane.f32.xlu1 %v778_v34  ;;  %776 = vadd.xlane.f32.xlu0 %v775_v35  ;;  %v309_v37 = vld [vmem:[%s3836_s19 + $0xd6] sm:$0x3] }
  0xcf   : > { %v576_v44 = vpop.xlane.xlu1 %575  ;;  %v573_v45 = vpop.xlane.xlu0 %572 }
  0xd0   : > { %v3152_v48 = vsel %vm3124_vm1, %v2067_v42, %v2063_v43  ;;  %v1391_v49 = vmul.f32 0.0625, %v576_v44  ;;  %v1390_v50 = vmul.f32 0.0625, %v573_v45  ;;  %v814_v44 = vsel %vm492_vm0, %v309_v37, 0.0  ;;  %v318_v37 = vld [vmem:[%s3836_s19 + $0xe8] sm:$0x3] }
  0xd1   : > { %v811_v45 = vsel %vm492_vm0, %v308_v38, 0.0 }
  0xd2   : > { %v2075_v53 = vrot.slane %v1391_v49, %v3984_v23  ;;  %v2071_v54 = vrot.slane %v1390_v50, %v3984_v23  ;;  %785 = vadd.xlane.f32.xlu1 %v784_v46  ;;  %782 = vadd.xlane.f32.xlu0 %v781_v47  ;;  %v311_v49 = vld [vmem:[%s3836_s19 + $0xda] sm:$0x3]  ;;  %v310_v50 = vld [vmem:[%s3836_s19 + $0xd8] sm:$0x3] }
  0xd3   : > { %v582_v55 = vpop.xlane.xlu1 %581  ;;  %v579_v57 = vpop.xlane.xlu0 %578 }
  0xd4   : > { %v3153_v60 = vsel %vm3126_vm2, %v2071_v54, %v3152_v48  ;;  %v1393_v61 = vmul.f32 0.0625, %v582_v55  ;;  %v1392_v62 = vmul.f32 0.0625, %v579_v57  ;;  %v820_v57 = vsel %vm492_vm0, %v311_v49, 0.0  ;;  %v321_v49 = vld [vmem:[%s3836_s19 + $0xee] sm:$0x3] }
  0xd5   : > { %v3154_v1 = vsel %vm3128_vm3, %v2075_v53, %v3153_v60 }
  0xd6   : > { %v2083_v2 = vrot.slane %v1393_v61, %v3984_v23  ;;  %v2079_v3 = vrot.slane %v1392_v62, %v3984_v23  ;;  %791 = vadd.xlane.f32.xlu1 %v790_v58  ;;  %788 = vadd.xlane.f32.xlu0 %v787_v59  ;;  %v817_v58 = vsel %vm492_vm0, %v310_v50, 0.0  ;;  %v313_v62 = vld [vmem:[%s3836_s19 + $0xde] sm:$0x3]  ;;  %v320_v50 = vld [vmem:[%s3836_s19 + $0xec] sm:$0x3] }
  0xd7   : > { %v588_v4 = vpop.xlane.xlu1 %587  ;;  %v585_v5 = vpop.xlane.xlu0 %584 }
  0xd8   : > { %v3155_v9 = vsel %vm3130_vm4, %v2079_v3, %v3154_v1  ;;  %v1395_v10 = vmul.f32 0.0625, %v588_v4  ;;  %v1394_v11 = vmul.f32 0.0625, %v585_v5  ;;  %v826_v5 = vsel %vm492_vm0, %v313_v62, 0.0  ;;  %v322_v62 = vld [vmem:[%s3836_s19 + $0xf0] sm:$0x3] }
  0xd9   : > { %v3156_v14 = vsel %vm3132_vm5, %v2083_v2, %v3155_v9 }
  0xda   : > { %v2091_v15 = vrot.slane %v1395_v10, %v3984_v23  ;;  %v2087_v16 = vrot.slane %v1394_v11, %v3984_v23  ;;  %797 = vadd.xlane.f32.xlu1 %v796_v6  ;;  %794 = vadd.xlane.f32.xlu0 %v793_v7  ;;  %v823_v6 = vsel %vm492_vm0, %v312_v63, 0.0  ;;  %v315_v10 = vld [vmem:[%s3836_s19 + $0xe2] sm:$0x3]  ;;  %v314_v11 = vld [vmem:[%s3836_s19 + $0xe0] sm:$0x3] }
  0xdb   : > { %v594_v17 = vpop.xlane.xlu1 %593  ;;  %v591_v18 = vpop.xlane.xlu0 %590 }
  0xdc   : > { %v1397_v21 = vmul.f32 0.0625, %v594_v17  ;;  %v1396_v22 = vmul.f32 0.0625, %v591_v18  ;;  %v3157_v26 = vsel %vm3134_vm6, %v2087_v16, %v3156_v14  ;;  %v832_v18 = vsel %vm492_vm0, %v315_v10, 0.0 }
  0xdd   : > { %v4116_v27 = vsel %vm3136_vm7, %v2091_v15, %v3157_v26 }
  0xde   : > { %v2099_v28 = vrot.slane %v1397_v21, %v3984_v23  ;;  %v2095_v29 = vrot.slane %v1396_v22, %v3984_v23  ;;  %803 = vadd.xlane.f32.xlu1 %v802_v19  ;;  %800 = vadd.xlane.f32.xlu0 %v799_v20  ;;  %v829_v19 = vsel %vm492_vm0, %v314_v11, 0.0  ;;  %v325_v11 = vld [vmem:[%s3836_s19 + $0xf6] sm:$0x3] }
  0xdf   : > { %v600_v30 = vpop.xlane.xlu1 %599  ;;  %v597_v31 = vpop.xlane.xlu0 %596 }
  0xe0   : > { %v3159_v34 = vsel %vm3124_vm1, %v2099_v28, %v2095_v29  ;;  %v1399_v35 = vmul.f32 0.0625, %v600_v30  ;;  %v1398_v36 = vmul.f32 0.0625, %v597_v31  ;;  %v838_v31 = vsel %vm492_vm0, %v317_v24, 0.0  ;;  %v327_v24 = vld [vmem:[%s3836_s19 + $0xfa] sm:$0x3] }
  0xe2   : > { %v2107_v39 = vrot.slane %v1399_v35, %v3984_v23  ;;  %v2103_v40 = vrot.slane %v1398_v36, %v3984_v23  ;;  %809 = vadd.xlane.f32.xlu1 %v808_v32  ;;  %806 = vadd.xlane.f32.xlu0 %v805_v33  ;;  %v835_v32 = vsel %vm492_vm0, %v316_v25, 0.0  ;;  %v319_v36 = vld [vmem:[%s3836_s19 + $0xea] sm:$0x3]  ;;  %v326_v25 = vld [vmem:[%s3836_s19 + $0xf8] sm:$0x3] }
  0xe3   : > { %v606_v42 = vpop.xlane.xlu1 %605  ;;  %v603_v43 = vpop.xlane.xlu0 %602 }
  0xe4   : > { %v3160_v46 = vsel %vm3126_vm2, %v2103_v40, %v3159_v34  ;;  %v1401_v47 = vmul.f32 0.0625, %v606_v42  ;;  %v1400_v48 = vmul.f32 0.0625, %v603_v43 }
  0xe5   : > { %v3161_v51 = vsel %vm3128_vm3, %v2107_v39, %v3160_v46 }
  0xe6   : > { %v2115_v52 = vrot.slane %v1401_v47, %v3984_v23  ;;  %v2111_v53 = vrot.slane %v1400_v48, %v3984_v23  ;;  %815 = vadd.xlane.f32.xlu1 %v814_v44  ;;  %812 = vadd.xlane.f32.xlu0 %v811_v45  ;;  %v844_v44 = vsel %vm492_vm0, %v319_v36, 0.0  ;;  %v841_v45 = vsel %vm492_vm0, %v318_v37, 0.0  ;;  %v329_v37 = vld [vmem:[%s3836_s19 + $0xfe] sm:$0x3] }
  0xe7   : > { %v612_v54 = vpop.xlane.xlu1 %611  ;;  %v609_v55 = vpop.xlane.xlu0 %608 }
  0xe8   : > { %v3162_v59 = vsel %vm3130_vm4, %v2111_v53, %v3161_v51  ;;  %v1403_v60 = vmul.f32 0.0625, %v612_v54  ;;  %v1402_v61 = vmul.f32 0.0625, %v609_v55 }
  0xe9   : > { %v3163_v0 = vsel %vm3132_vm5, %v2115_v52, %v3162_v59 }
  0xea   : > { %v2123_v1 = vrot.slane %v1403_v60, %v3984_v23  ;;  %v2119_v2 = vrot.slane %v1402_v61, %v3984_v23  ;;  %821 = vadd.xlane.f32.xlu1 %v820_v57  ;;  %818 = vadd.xlane.f32.xlu0 %v817_v58  ;;  %v850_v57 = vsel %vm492_vm0, %v321_v49, 0.0  ;;  %v847_v58 = vsel %vm492_vm0, %v320_v50, 0.0  ;;  %v323_v61 = vld [vmem:[%s3836_s19 + $0xf2] sm:$0x3]  ;;  %v331_v49 = vld [vmem:[%s3836_s19 + $0x102] sm:$0x3] }
  0xeb   : > { %v618_v3 = vpop.xlane.xlu1 %617  ;;  %v615_v4 = vpop.xlane.xlu0 %614  ;;  %v330_v50 = vld [vmem:[%s3836_s19 + $0x100] sm:$0x3] }
  0xec   : > { %v1405_v7 = vmul.f32 0.0625, %v618_v3  ;;  %v1404_v9 = vmul.f32 0.0625, %v615_v4  ;;  %v3164_v12 = vsel %vm3134_vm6, %v2119_v2, %v3163_v0 }
  0xed   : > { %v4149_v13 = vsel %vm3136_vm7, %v2123_v1, %v3164_v12  ;;  %v324_v12 = vld [vmem:[%s3836_s19 + $0xf4] sm:$0x3] }
  0xee   : > { %v2131_v14 = vrot.slane %v1405_v7, %v3984_v23  ;;  %v2127_v15 = vrot.slane %v1404_v9, %v3984_v23  ;;  %827 = vadd.xlane.f32.xlu1 %v826_v5  ;;  %824 = vadd.xlane.f32.xlu0 %v823_v6  ;;  %v856_v5 = vsel %vm492_vm0, %v323_v61, 0.0  ;;  %v853_v6 = vsel %vm492_vm0, %v322_v62, 0.0 }
  0xef   : > { %v624_v16 = vpop.xlane.xlu1 %623  ;;  %v621_v17 = vpop.xlane.xlu0 %620 }
  0xf0   : > { %v3166_v20 = vsel %vm3124_vm1, %v2131_v14, %v2127_v15  ;;  %v1407_v21 = vmul.f32 0.0625, %v624_v16  ;;  %v1406_v22 = vmul.f32 0.0625, %v621_v17 }
  0xf2   : > { %v2139_v26 = vrot.slane %v1407_v21, %v3984_v23  ;;  %v2135_v28 = vrot.slane %v1406_v22, %v3984_v23  ;;  %833 = vadd.xlane.f32.xlu1 %v832_v18  ;;  %830 = vadd.xlane.f32.xlu0 %v829_v19  ;;  %v862_v18 = vsel %vm492_vm0, %v325_v11, 0.0  ;;  %v859_v19 = vsel %vm492_vm0, %v324_v12, 0.0  ;;  %v335_v12 = vld [vmem:[%s3836_s19 + $0x10a] sm:$0x3] }
  0xf3   : > { %v630_v29 = vpop.xlane.xlu1 %629  ;;  %v627_v30 = vpop.xlane.xlu0 %626 }
  0xf4   : > { %v3167_v33 = vsel %vm3126_vm2, %v2135_v28, %v3166_v20  ;;  %v1409_v34 = vmul.f32 0.0625, %v630_v29  ;;  %v1408_v35 = vmul.f32 0.0625, %v627_v30 }
  0xf5   : > { %v3168_v38 = vsel %vm3128_vm3, %v2139_v26, %v3167_v33  ;;  %v865_v33 = vsel %vm492_vm0, %v326_v25, 0.0 }
  0xf6   : > { %v2147_v39 = vrot.slane %v1409_v34, %v3984_v23  ;;  %v2143_v40 = vrot.slane %v1408_v35, %v3984_v23  ;;  %839 = vadd.xlane.f32.xlu1 %v838_v31  ;;  %836 = vadd.xlane.f32.xlu0 %v835_v32  ;;  %v868_v32 = vsel %vm492_vm0, %v327_v24, 0.0 }
  0xf7   : > { %v636_v42 = vpop.xlane.xlu1 %635  ;;  %v633_v43 = vpop.xlane.xlu0 %632 }
  0xf8   : > { %v3169_v46 = vsel %vm3130_vm4, %v2143_v40, %v3168_v38  ;;  %v1411_v47 = vmul.f32 0.0625, %v636_v42  ;;  %v1410_v48 = vmul.f32 0.0625, %v633_v43  ;;  %v328_v38 = vld [vmem:[%s3836_s19 + $0xfc] sm:$0x3] }
  0xf9   : > { %v3170_v51 = vsel %vm3132_vm5, %v2147_v39, %v3169_v46  ;;  %v871_v46 = vsel %vm492_vm0, %v328_v38, 0.0  ;;  %v339_v38 = vld [vmem:[%s3836_s19 + $0x112] sm:$0x3] }
  0xfa   : > { %v2155_v52 = vrot.slane %v1411_v47, %v3984_v23  ;;  %v2151_v53 = vrot.slane %v1410_v48, %v3984_v23  ;;  %845 = vadd.xlane.f32.xlu1 %v844_v44  ;;  %842 = vadd.xlane.f32.xlu0 %v841_v45  ;;  %v874_v45 = vsel %vm492_vm0, %v329_v37, 0.0 }
  0xfb   : > { %v642_v54 = vpop.xlane.xlu1 %641  ;;  %v639_v55 = vpop.xlane.xlu0 %638 }
  0xfc   : > { %v1413_v59 = vmul.f32 0.0625, %v642_v54  ;;  %v1412_v60 = vmul.f32 0.0625, %v639_v55  ;;  %v3171_v63 = vsel %vm3134_vm6, %v2151_v53, %v3170_v51 }
  0xfd   : > { %v4182_v0 = vsel %vm3136_vm7, %v2155_v52, %v3171_v63  ;;  %v333_v63 = vld [vmem:[%s3836_s19 + $0x106] sm:$0x3] }
  0xfe   : > { %v2163_v1 = vrot.slane %v1413_v59, %v3984_v23  ;;  %v2159_v2 = vrot.slane %v1412_v60, %v3984_v23  ;;  %851 = vadd.xlane.f32.xlu1 %v850_v57  ;;  %848 = vadd.xlane.f32.xlu0 %v847_v58  ;;  %v880_v58 = vsel %vm492_vm0, %v331_v49, 0.0  ;;  %v877_v59 = vsel %vm492_vm0, %v330_v50, 0.0 }
  0xff   : > { %v648_v3 = vpop.xlane.xlu1 %647  ;;  %v645_v4 = vpop.xlane.xlu0 %644 }
 0x100   : > { %v3173_v7 = vsel %vm3124_vm1, %v2163_v1, %v2159_v2  ;;  %v1415_v9 = vmul.f32 0.0625, %v648_v3  ;;  %v1414_v10 = vmul.f32 0.0625, %v645_v4  ;;  %v332_v1 = vld [vmem:[%s3836_s19 + $0x104] sm:$0x3] }
 0x102   : > { %v2171_v14 = vrot.slane %v1415_v9, %v3984_v23  ;;  %v2167_v15 = vrot.slane %v1414_v10, %v3984_v23  ;;  %857 = vadd.xlane.f32.xlu1 %v856_v5  ;;  %854 = vadd.xlane.f32.xlu0 %v853_v6  ;;  %v886_v6 = vsel %vm492_vm0, %v333_v63, 0.0 }
 0x103   : > { %v654_v16 = vpop.xlane.xlu1 %653  ;;  %v651_v17 = vpop.xlane.xlu0 %650 }
 0x104   : > { %v3174_v20 = vsel %vm3126_vm2, %v2167_v15, %v3173_v7  ;;  %v1417_v21 = vmul.f32 0.0625, %v654_v16  ;;  %v1416_v22 = vmul.f32 0.0625, %v651_v17  ;;  %v883_v7 = vsel %vm492_vm0, %v332_v1, 0.0 }
 0x105   : > { %v3175_v26 = vsel %vm3128_vm3, %v2171_v14, %v3174_v20  ;;  %v334_v14 = vld [vmem:[%s3836_s19 + $0x108] sm:$0x3]  ;;  %v892_v20 = vsel %vm492_vm0, %v335_v12, 0.0 }
 0x106   : > { %v2179_v28 = vrot.slane %v1417_v21, %v3984_v23  ;;  %v2175_v29 = vrot.slane %v1416_v22, %v3984_v23  ;;  %863 = vadd.xlane.f32.xlu1 %v862_v18  ;;  %860 = vadd.xlane.f32.xlu0 %v859_v19  ;;  %v889_v21 = vsel %vm492_vm0, %v334_v14, 0.0 }
 0x107   : > { %v660_v30 = vpop.xlane.xlu1 %659  ;;  %v657_v31 = vpop.xlane.xlu0 %656 }
 0x108   : > { %v3176_v34 = vsel %vm3130_vm4, %v2175_v29, %v3175_v26  ;;  %v1419_v35 = vmul.f32 0.0625, %v660_v30  ;;  %v1418_v36 = vmul.f32 0.0625, %v657_v31  ;;  %v337_v26 = vld [vmem:[%s3836_s19 + $0x10e] sm:$0x3] }
 0x109   : > { %v3177_v39 = vsel %vm3132_vm5, %v2179_v28, %v3176_v34  ;;  %v336_v28 = vld [vmem:[%s3836_s19 + $0x10c] sm:$0x3]  ;;  %v898_v34 = vsel %vm492_vm0, %v337_v26, 0.0 }
 0x10a   : > { %v2187_v40 = vrot.slane %v1419_v35, %v3984_v23  ;;  %v2183_v42 = vrot.slane %v1418_v36, %v3984_v23  ;;  %869 = vadd.xlane.f32.xlu1 %v868_v32  ;;  %866 = vadd.xlane.f32.xlu0 %v865_v33  ;;  %v895_v35 = vsel %vm492_vm0, %v336_v28, 0.0 }
 0x10b   : > { %v666_v43 = vpop.xlane.xlu1 %665  ;;  %v663_v44 = vpop.xlane.xlu0 %662 }
 0x10c   : > { %v1421_v47 = vmul.f32 0.0625, %v666_v43  ;;  %v1420_v48 = vmul.f32 0.0625, %v663_v44  ;;  %v3178_v51 = vsel %vm3134_vm6, %v2183_v42, %v3177_v39  ;;  %v338_v39 = vld [vmem:[%s3836_s19 + $0x110] sm:$0x3] }
 0x10d   : > { %v4215_v52 = vsel %vm3136_vm7, %v2187_v40, %v3178_v51 }
 0x10e   : > { %v2195_v53 = vrot.slane %v1421_v47, %v3984_v23  ;;  %v2191_v54 = vrot.slane %v1420_v48, %v3984_v23  ;;  %875 = vadd.xlane.f32.xlu1 %v874_v45  ;;  %872 = vadd.xlane.f32.xlu0 %v871_v46  ;;  %v904_v47 = vsel %vm492_vm0, %v339_v38, 0.0  ;;  %v901_v48 = vsel %vm492_vm0, %v338_v39, 0.0 }
 0x10f   : > { %v672_v55 = vpop.xlane.xlu1 %671  ;;  %v669_v57 = vpop.xlane.xlu0 %668 }
 0x110   : > { %v3180_v60 = vsel %vm3124_vm1, %v2195_v53, %v2191_v54  ;;  %v1423_v61 = vmul.f32 0.0625, %v672_v55  ;;  %v1422_v62 = vmul.f32 0.0625, %v669_v57  ;;  %v341_v53 = vld [vmem:[%s3836_s19 + $0x116] sm:$0x3]  ;;  %v340_v54 = vld [vmem:[%s3836_s19 + $0x114] sm:$0x3] }
 0x112   : > { %v2203_v2 = vrot.slane %v1423_v61, %v3984_v23  ;;  %v2199_v3 = vrot.slane %v1422_v62, %v3984_v23  ;;  %881 = vadd.xlane.f32.xlu1 %v880_v58  ;;  %878 = vadd.xlane.f32.xlu0 %v877_v59  ;;  %v907_v61 = vsel %vm492_vm0, %v340_v54, 0.0 }
 0x113   : > { %v678_v4 = vpop.xlane.xlu1 %677  ;;  %v675_v5 = vpop.xlane.xlu0 %674 }
 0x114   : > { %v3181_v9 = vsel %vm3126_vm2, %v2199_v3, %v3180_v60  ;;  %v1425_v10 = vmul.f32 0.0625, %v678_v4  ;;  %v1424_v11 = vmul.f32 0.0625, %v675_v5  ;;  %v910_v60 = vsel %vm492_vm0, %v341_v53, 0.0  ;;  %v342_v3 = vld [vmem:[%s3836_s19 + $0x118] sm:$0x3] }
 0x115   : > { %v3182_v15 = vsel %vm3128_vm3, %v2203_v2, %v3181_v9  ;;  %v343_v2 = vld [vmem:[%s3836_s19 + $0x11a] sm:$0x3] }
 0x116   : > { %v2211_v16 = vrot.slane %v1425_v10, %v3984_v23  ;;  %v2207_v17 = vrot.slane %v1424_v11, %v3984_v23  ;;  %887 = vadd.xlane.f32.xlu1 %v886_v6  ;;  %884 = vadd.xlane.f32.xlu0 %v883_v7  ;;  %v916_v10 = vsel %vm492_vm0, %v343_v2, 0.0  ;;  %v913_v11 = vsel %vm492_vm0, %v342_v3, 0.0 }
 0x117   : > { %v684_v18 = vpop.xlane.xlu1 %683  ;;  %v681_v19 = vpop.xlane.xlu0 %680 }
 0x118   : > { %v3183_v22 = vsel %vm3130_vm4, %v2207_v17, %v3182_v15  ;;  %v1427_v24 = vmul.f32 0.0625, %v684_v18  ;;  %v1426_v25 = vmul.f32 0.0625, %v681_v19  ;;  %v344_v17 = vld [vmem:[%s3836_s19 + $0x11c] sm:$0x3] }
 0x119   : > { %v3184_v29 = vsel %vm3132_vm5, %v2211_v16, %v3183_v22  ;;  %v345_v16 = vld [vmem:[%s3836_s19 + $0x11e] sm:$0x3] }
 0x11a   : > { %v2219_v30 = vrot.slane %v1427_v24, %v3984_v23  ;;  %v2215_v31 = vrot.slane %v1426_v25, %v3984_v23  ;;  %893 = vadd.xlane.f32.xlu1 %v892_v20  ;;  %890 = vadd.xlane.f32.xlu0 %v889_v21  ;;  %v922_v24 = vsel %vm492_vm0, %v345_v16, 0.0  ;;  %v919_v25 = vsel %vm492_vm0, %v344_v17, 0.0 }
 0x11b   : > { %v690_v32 = vpop.xlane.xlu1 %689  ;;  %v687_v33 = vpop.xlane.xlu0 %686 }
 0x11c   : > { %v1429_v36 = vmul.f32 0.0625, %v690_v32  ;;  %v1428_v37 = vmul.f32 0.0625, %v687_v33  ;;  %v3185_v40 = vsel %vm3134_vm6, %v2215_v31, %v3184_v29  ;;  %v451_v29 = vld [vmem:[%s3836_s19 + $0x1f2] sm:$0x3] }
 0x11d   : > { %v4248_v42 = vsel %vm3136_vm7, %v2219_v30, %v3185_v40  ;;  %v450_v30 = vld [vmem:[%s3836_s19 + $0x1f0] sm:$0x3] }
 0x11e   : > { %v2227_v43 = vrot.slane %v1429_v36, %v3984_v23  ;;  %v2223_v44 = vrot.slane %v1428_v37, %v3984_v23  ;;  %899 = vadd.xlane.f32.xlu1 %v898_v34  ;;  %896 = vadd.xlane.f32.xlu0 %v895_v35  ;;  %v1240_v37 = vsel %vm492_vm0, %v451_v29, 0.0  ;;  %v1237_v38 = vsel %vm492_vm0, %v450_v30, 0.0 }
 0x11f   : > { %v696_v45 = vpop.xlane.xlu1 %695  ;;  %v693_v46 = vpop.xlane.xlu0 %692 }
 0x120   : > { %v3187_v49 = vsel %vm3124_vm1, %v2227_v43, %v2223_v44  ;;  %v1431_v50 = vmul.f32 0.0625, %v696_v45  ;;  %v1430_v51 = vmul.f32 0.0625, %v693_v46  ;;  %v442_v44 = vld [vmem:[%s3836_s19 + $0x1e0] sm:$0x3]  ;;  %v452_v45 = vld [vmem:[%s3836_s19 + $0x1f4] sm:$0x3] }
 0x122   : > { %v2235_v55 = vrot.slane %v1431_v50, %v3984_v23  ;;  %v2231_v57 = vrot.slane %v1430_v51, %v3984_v23  ;;  %905 = vadd.xlane.f32.xlu1 %v904_v47  ;;  %902 = vadd.xlane.f32.xlu0 %v901_v48  ;;  %v1213_v50 = vsel %vm492_vm0, %v442_v44, 0.0  ;;  %v1243_v51 = vsel %vm492_vm0, %v452_v45, 0.0 }
 0x123   : > { %v702_v58 = vpop.xlane.xlu1 %701  ;;  %v699_v59 = vpop.xlane.xlu0 %698 }
 0x124   : > { %v3188_v62 = vsel %vm3126_vm2, %v2231_v57, %v3187_v49  ;;  %v1433_v63 = vmul.f32 0.0625, %v702_v58  ;;  %v1432_v1 = vmul.f32 0.0625, %v699_v59  ;;  %v453_v57 = vld [vmem:[%s3836_s19 + $0x1f6] sm:$0x3]  ;;  %v443_v58 = vld [vmem:[%s3836_s19 + $0x1e2] sm:$0x3] }
 0x125   : > { %v3189_v4 = vsel %vm3128_vm3, %v2235_v55, %v3188_v62  ;;  %v1216_v2 = vsel %vm492_vm0, %v443_v58, 0.0 }
 0x126   : > { %v2243_v5 = vrot.slane %v1433_v63, %v3984_v23  ;;  %v2239_v6 = vrot.slane %v1432_v1, %v3984_v23  ;;  %911 = vadd.xlane.f32.xlu1 %v910_v60  ;;  %908 = vadd.xlane.f32.xlu0 %v907_v61  ;;  %v1246_v1 = vsel %vm492_vm0, %v453_v57, 0.0 }
 0x127   : > { %v708_v7 = vpop.xlane.xlu1 %707  ;;  %v705_v9 = vpop.xlane.xlu0 %704 }
 0x128   : > { %v3190_v12 = vsel %vm3130_vm4, %v2239_v6, %v3189_v4  ;;  %v1435_v14 = vmul.f32 0.0625, %v708_v7  ;;  %v1434_v15 = vmul.f32 0.0625, %v705_v9  ;;  %v454_v6 = vld [vmem:[%s3836_s19 + $0x1f8] sm:$0x3]  ;;  %v444_v7 = vld [vmem:[%s3836_s19 + $0x1e4] sm:$0x3] }
 0x129   : > { %v3191_v18 = vsel %vm3132_vm5, %v2243_v5, %v3190_v12  ;;  %v1219_v16 = vsel %vm492_vm0, %v444_v7, 0.0 }
 0x12a   : > { %v2251_v19 = vrot.slane %v1435_v14, %v3984_v23  ;;  %v2247_v20 = vrot.slane %v1434_v15, %v3984_v23  ;;  %917 = vadd.xlane.f32.xlu1 %v916_v10  ;;  %914 = vadd.xlane.f32.xlu0 %v913_v11  ;;  %v1249_v15 = vsel %vm492_vm0, %v454_v6, 0.0 }
 0x12b   : > { %v714_v21 = vpop.xlane.xlu1 %713  ;;  %v711_v22 = vpop.xlane.xlu0 %710 }
 0x12c   : > { %v1437_v26 = vmul.f32 0.0625, %v714_v21  ;;  %v1436_v28 = vmul.f32 0.0625, %v711_v22  ;;  %v3192_v31 = vsel %vm3134_vm6, %v2247_v20, %v3191_v18  ;;  %v434_v20 = vld [vmem:[%s3836_s19 + $0x1d0] sm:$0x3] }
 0x12d   : > { %v4281_v32 = vsel %vm3136_vm7, %v2251_v19, %v3192_v31  ;;  %v435_v19 = vld [vmem:[%s3836_s19 + $0x1d2] sm:$0x3]  ;;  %v1189_v30 = vsel %vm492_vm0, %v434_v20, 0.0 }
 0x12e   : > { %v2259_v33 = vrot.slane %v1437_v26, %v3984_v23  ;;  %v2255_v34 = vrot.slane %v1436_v28, %v3984_v23  ;;  %923 = vadd.xlane.f32.xlu1 %v922_v24  ;;  %920 = vadd.xlane.f32.xlu0 %v919_v25  ;;  %v1192_v29 = vsel %vm492_vm0, %v435_v19, 0.0 }
 0x12f   : > { %v720_v35 = vpop.xlane.xlu1 %719  ;;  %v717_v36 = vpop.xlane.xlu0 %716 }
 0x130   : > { %v3194_v39 = vsel %vm3124_vm1, %v2259_v33, %v2255_v34  ;;  %v1439_v40 = vmul.f32 0.0625, %v720_v35  ;;  %v1438_v43 = vmul.f32 0.0625, %v717_v36  ;;  %v455_v35 = vld [vmem:[%s3836_s19 + $0x1fa] sm:$0x3]  ;;  %v445_v36 = vld [vmem:[%s3836_s19 + $0x1e6] sm:$0x3] }
 0x131   : > { %v1222_v44 = vsel %vm492_vm0, %v445_v36, 0.0 }
 0x132   : > { %v2267_v46 = vrot.slane %v1439_v40, %v3984_v23  ;;  %v2263_v47 = vrot.slane %v1438_v43, %v3984_v23  ;;  %1241 = vadd.xlane.f32.xlu1 %v1240_v37  ;;  %1238 = vadd.xlane.f32.xlu0 %v1237_v38  ;;  %v1252_v43 = vsel %vm492_vm0, %v455_v35, 0.0 }
 0x133   : > { %v726_v48 = vpop.xlane.xlu1 %725  ;;  %v723_v49 = vpop.xlane.xlu0 %722 }
 0x134   : > { %v3195_v53 = vsel %vm3126_vm2, %v2263_v47, %v3194_v39  ;;  %v1441_v54 = vmul.f32 0.0625, %v726_v48  ;;  %v1440_v55 = vmul.f32 0.0625, %v723_v49  ;;  %v446_v48 = vld [vmem:[%s3836_s19 + $0x1e8] sm:$0x3]  ;;  %v436_v49 = vld [vmem:[%s3836_s19 + $0x1d4] sm:$0x3] }
 0x135   : > { %v3196_v59 = vsel %vm3128_vm3, %v2267_v46, %v3195_v53  ;;  %v1225_v57 = vsel %vm492_vm0, %v446_v48, 0.0  ;;  %v1195_v58 = vsel %vm492_vm0, %v436_v49, 0.0 }
 0x136   : > { %v2275_v60 = vrot.slane %v1441_v54, %v3984_v23  ;;  %v2271_v61 = vrot.slane %v1440_v55, %v3984_v23  ;;  %1214 = vadd.xlane.f32.xlu1 %v1213_v50  ;;  %1244 = vadd.xlane.f32.xlu0 %v1243_v51 }
 0x137   : > { %v732_v62 = vpop.xlane.xlu1 %731  ;;  %v729_v63 = vpop.xlane.xlu0 %728 }
 0x138   : > { %v3197_v3 = vsel %vm3130_vm4, %v2271_v61, %v3196_v59  ;;  %v1443_v4 = vmul.f32 0.0625, %v732_v62  ;;  %v1442_v5 = vmul.f32 0.0625, %v729_v63  ;;  %v426_v62 = vld [vmem:[%s3836_s19 + $0x1c0] sm:$0x3]  ;;  %v456_v63 = vld [vmem:[%s3836_s19 + $0x1fc] sm:$0x3] }
 0x139   : > { %v3198_v9 = vsel %vm3132_vm5, %v2275_v60, %v3197_v3  ;;  %v1165_v6 = vsel %vm492_vm0, %v426_v62, 0.0  ;;  %v1255_v7 = vsel %vm492_vm0, %v456_v63, 0.0 }
 0x13a   : > { %v2283_v10 = vrot.slane %v1443_v4, %v3984_v23  ;;  %v2279_v11 = vrot.slane %v1442_v5, %v3984_v23  ;;  %1247 = vadd.xlane.f32.xlu1 %v1246_v1  ;;  %1217 = vadd.xlane.f32.xlu0 %v1216_v2 }
 0x13b   : > { %v738_v12 = vpop.xlane.xlu1 %737  ;;  %v735_v14 = vpop.xlane.xlu0 %734 }
 0x13c   : > { %v1445_v17 = vmul.f32 0.0625, %v738_v12  ;;  %v1444_v18 = vmul.f32 0.0625, %v735_v14  ;;  %v3199_v21 = vsel %vm3134_vm6, %v2279_v11, %v3198_v9  ;;  %v437_v11 = vld [vmem:[%s3836_s19 + $0x1d6] sm:$0x3]  ;;  %v427_v12 = vld [vmem:[%s3836_s19 + $0x1c2] sm:$0x3] }
 0x13d   : > { %v4314_v22 = vsel %vm3136_vm7, %v2283_v10, %v3199_v21  ;;  %v1198_v20 = vsel %vm492_vm0, %v437_v11, 0.0  ;;  %v1168_v21 = vsel %vm492_vm0, %v427_v12, 0.0 }
 0x13e   : > { %v2291_v24 = vrot.slane %v1445_v17, %v3984_v23  ;;  %v2287_v25 = vrot.slane %v1444_v18, %v3984_v23  ;;  %1250 = vadd.xlane.f32.xlu1 %v1249_v15  ;;  %1220 = vadd.xlane.f32.xlu0 %v1219_v16 }
 0x13f   : > { %v744_v26 = vpop.xlane.xlu1 %743  ;;  %v741_v28 = vpop.xlane.xlu0 %740 }
 0x140   : > { %v3201_v31 = vsel %vm3124_vm1, %v2291_v24, %v2287_v25  ;;  %v1447_v33 = vmul.f32 0.0625, %v744_v26  ;;  %v1446_v34 = vmul.f32 0.0625, %v741_v28  ;;  %v457_v28 = vld [vmem:[%s3836_s19 + $0x1fe] sm:$0x3] }
 0x141   : > { %v1258_v35 = vsel %vm492_vm0, %v457_v28, 0.0 }
 0x142   : > { %v2299_v37 = vrot.slane %v1447_v33, %v3984_v23  ;;  %v2295_v38 = vrot.slane %v1446_v34, %v3984_v23  ;;  %1193 = vadd.xlane.f32.xlu1 %v1192_v29  ;;  %1190 = vadd.xlane.f32.xlu0 %v1189_v30  ;;  %v447_v29 = vld [vmem:[%s3836_s19 + $0x1ea] sm:$0x3] }
 0x143   : > { %v750_v39 = vpop.xlane.xlu1 %749  ;;  %v747_v40 = vpop.xlane.xlu0 %746  ;;  %v1228_v36 = vsel %vm492_vm0, %v447_v29, 0.0 }
 0x144   : > { %v3202_v45 = vsel %vm3126_vm2, %v2295_v38, %v3201_v31  ;;  %v1449_v46 = vmul.f32 0.0625, %v750_v39  ;;  %v1448_v47 = vmul.f32 0.0625, %v747_v40  ;;  %v438_v40 = vld [vmem:[%s3836_s19 + $0x1d8] sm:$0x3] }
 0x145   : > { %v3203_v50 = vsel %vm3128_vm3, %v2299_v37, %v3202_v45  ;;  %v1201_v49 = vsel %vm492_vm0, %v438_v40, 0.0 }
 0x146   : > { %v2307_v51 = vrot.slane %v1449_v46, %v3984_v23  ;;  %v2303_v53 = vrot.slane %v1448_v47, %v3984_v23  ;;  %1253 = vadd.xlane.f32.xlu1 %v1252_v43  ;;  %1223 = vadd.xlane.f32.xlu0 %v1222_v44  ;;  %v428_v43 = vld [vmem:[%s3836_s19 + $0x1c4] sm:$0x3] }
 0x147   : > { %v756_v54 = vpop.xlane.xlu1 %755  ;;  %v753_v55 = vpop.xlane.xlu0 %752 }
 0x148   : > { %v3204_v59 = vsel %vm3130_vm4, %v2303_v53, %v3203_v50  ;;  %v1451_v60 = vmul.f32 0.0625, %v756_v54  ;;  %v1450_v61 = vmul.f32 0.0625, %v753_v55  ;;  %v1171_v50 = vsel %vm492_vm0, %v428_v43, 0.0  ;;  %v418_v55 = vld [vmem:[%s3836_s19 + $0x1b0] sm:$0x3] }
 0x149   : > { %v3205_v1 = vsel %vm3132_vm5, %v2307_v51, %v3204_v59  ;;  %v1141_v63 = vsel %vm492_vm0, %v418_v55, 0.0 }
 0x14a   : > { %v2315_v2 = vrot.slane %v1451_v60, %v3984_v23  ;;  %v2311_v3 = vrot.slane %v1450_v61, %v3984_v23  ;;  %1226 = vadd.xlane.f32.xlu1 %v1225_v57  ;;  %1196 = vadd.xlane.f32.xlu0 %v1195_v58  ;;  %v448_v57 = vld [vmem:[%s3836_s19 + $0x1ec] sm:$0x3] }
 0x14b   : > { %v762_v4 = vpop.xlane.xlu1 %761  ;;  %v759_v5 = vpop.xlane.xlu0 %758 }
 0x14c   : > { %v1453_v9 = vmul.f32 0.0625, %v762_v4  ;;  %v1452_v10 = vmul.f32 0.0625, %v759_v5  ;;  %v3206_v14 = vsel %vm3134_vm6, %v2311_v3, %v3205_v1  ;;  %v1231_v1 = vsel %vm492_vm0, %v448_v57, 0.0  ;;  %v429_v4 = vld [vmem:[%s3836_s19 + $0x1c6] sm:$0x3] }
 0x14d   : > { %v4347_v15 = vsel %vm3136_vm7, %v2315_v2, %v3206_v14  ;;  %v419_v5 = vld [vmem:[%s3836_s19 + $0x1b2] sm:$0x3]  ;;  %v1174_v14 = vsel %vm492_vm0, %v429_v4, 0.0 }
 0x14e   : > { %v2323_v16 = vrot.slane %v1453_v9, %v3984_v23  ;;  %v2319_v17 = vrot.slane %v1452_v10, %v3984_v23  ;;  %1166 = vadd.xlane.f32.xlu1 %v1165_v6  ;;  %1256 = vadd.xlane.f32.xlu0 %v1255_v7 }
 0x14f   : > { %v768_v18 = vpop.xlane.xlu1 %767  ;;  %v765_v19 = vpop.xlane.xlu0 %764 }
 0x150   : > { %v3208_v24 = vsel %vm3124_vm1, %v2323_v16, %v2319_v17  ;;  %v1455_v25 = vmul.f32 0.0625, %v768_v18  ;;  %v1454_v26 = vmul.f32 0.0625, %v765_v19  ;;  %v1144_v16 = vsel %vm492_vm0, %v419_v5, 0.0 }
 0x152   : > { %v2331_v30 = vrot.slane %v1455_v25, %v3984_v23  ;;  %v2327_v31 = vrot.slane %v1454_v26, %v3984_v23  ;;  %1199 = vadd.xlane.f32.xlu1 %v1198_v20  ;;  %1169 = vadd.xlane.f32.xlu0 %v1168_v21  ;;  %v449_v20 = vld [vmem:[%s3836_s19 + $0x1ee] sm:$0x3]  ;;  %v439_v21 = vld [vmem:[%s3836_s19 + $0x1da] sm:$0x3] }
 0x153   : > { %v774_v33 = vpop.xlane.xlu1 %773  ;;  %v771_v34 = vpop.xlane.xlu0 %770  ;;  %v1234_v29 = vsel %vm492_vm0, %v449_v20, 0.0 }
 0x154   : > { %v3209_v37 = vsel %vm3126_vm2, %v2327_v31, %v3208_v24  ;;  %v1457_v38 = vmul.f32 0.0625, %v774_v33  ;;  %v1456_v39 = vmul.f32 0.0625, %v771_v34 }
 0x155   : > { %v3210_v44 = vsel %vm3128_vm3, %v2331_v30, %v3209_v37  ;;  %v1204_v30 = vsel %vm492_vm0, %v439_v21, 0.0 }
 0x156   : > { %v2339_v45 = vrot.slane %v1457_v38, %v3984_v23  ;;  %v2335_v46 = vrot.slane %v1456_v39, %v3984_v23  ;;  %1259 = vadd.xlane.f32.xlu1 %v1258_v35  ;;  %1229 = vadd.xlane.f32.xlu0 %v1228_v36  ;;  %v430_v35 = vld [vmem:[%s3836_s19 + $0x1c8] sm:$0x3]  ;;  %v420_v36 = vld [vmem:[%s3836_s19 + $0x1b4] sm:$0x3] }
 0x157   : > { %v780_v47 = vpop.xlane.xlu1 %779  ;;  %v777_v48 = vpop.xlane.xlu0 %776 }
 0x158   : > { %v3211_v51 = vsel %vm3130_vm4, %v2335_v46, %v3210_v44  ;;  %v1459_v53 = vmul.f32 0.0625, %v780_v47  ;;  %v1458_v54 = vmul.f32 0.0625, %v777_v48  ;;  %v1177_v44 = vsel %vm492_vm0, %v430_v35, 0.0 }
 0x159   : > { %v3212_v58 = vsel %vm3132_vm5, %v2339_v45, %v3211_v51  ;;  %v1147_v45 = vsel %vm492_vm0, %v420_v36, 0.0 }
 0x15a   : > { %v2347_v59 = vrot.slane %v1459_v53, %v3984_v23  ;;  %v2343_v60 = vrot.slane %v1458_v54, %v3984_v23  ;;  %1202 = vadd.xlane.f32.xlu1 %v1201_v49  ;;  %1172 = vadd.xlane.f32.xlu0 %v1171_v50  ;;  %v410_v49 = vld [vmem:[%s3836_s19 + $0x1a0] sm:$0x3]  ;;  %v440_v50 = vld [vmem:[%s3836_s19 + $0x1dc] sm:$0x3] }
 0x15b   : > { %v786_v61 = vpop.xlane.xlu1 %785  ;;  %v783_v62 = vpop.xlane.xlu0 %782 }
 0x15c   : > { %v1461_v2 = vmul.f32 0.0625, %v786_v61  ;;  %v1460_v3 = vmul.f32 0.0625, %v783_v62  ;;  %v3213_v6 = vsel %vm3134_vm6, %v2343_v60, %v3212_v58  ;;  %v1117_v58 = vsel %vm492_vm0, %v410_v49, 0.0  ;;  %v421_v62 = vld [vmem:[%s3836_s19 + $0x1b6] sm:$0x3] }
 0x15d   : > { %v4380_v7 = vsel %vm3136_vm7, %v2347_v59, %v3213_v6  ;;  %v1207_v59 = vsel %vm492_vm0, %v440_v50, 0.0 }
 0x15e   : > { %v2355_v9 = vrot.slane %v1461_v2, %v3984_v23  ;;  %v2351_v10 = vrot.slane %v1460_v3, %v3984_v23  ;;  %1142 = vadd.xlane.f32.xlu1 %v1141_v63  ;;  %1232 = vadd.xlane.f32.xlu0 %v1231_v1  ;;  %v411_v63 = vld [vmem:[%s3836_s19 + $0x1a2] sm:$0x3] }
 0x15f   : > { %v792_v11 = vpop.xlane.xlu1 %791  ;;  %v789_v12 = vpop.xlane.xlu0 %788 }
 0x160   : > { %v3215_v17 = vsel %vm3124_vm1, %v2355_v9, %v2351_v10  ;;  %v1463_v18 = vmul.f32 0.0625, %v792_v11  ;;  %v1462_v19 = vmul.f32 0.0625, %v789_v12  ;;  %v1150_v9 = vsel %vm492_vm0, %v421_v62, 0.0 }
 0x161   : > { %v1120_v10 = vsel %vm492_vm0, %v411_v63, 0.0 }
 0x162   : > { %v2363_v24 = vrot.slane %v1463_v18, %v3984_v23  ;;  %v2359_v25 = vrot.slane %v1462_v19, %v3984_v23  ;;  %1175 = vadd.xlane.f32.xlu1 %v1174_v14  ;;  %1145 = vadd.xlane.f32.xlu0 %v1144_v16  ;;  %v441_v16 = vld [vmem:[%s3836_s19 + $0x1de] sm:$0x3] }
 0x163   : > { %v798_v26 = vpop.xlane.xlu1 %797  ;;  %v795_v28 = vpop.xlane.xlu0 %794 }
 0x164   : > { %v3216_v31 = vsel %vm3126_vm2, %v2359_v25, %v3215_v17  ;;  %v1465_v33 = vmul.f32 0.0625, %v798_v26  ;;  %v1464_v34 = vmul.f32 0.0625, %v795_v28  ;;  %v431_v17 = vld [vmem:[%s3836_s19 + $0x1ca] sm:$0x3] }
 0x165   : > { %v3217_v37 = vsel %vm3128_vm3, %v2363_v24, %v3216_v31  ;;  %v1210_v24 = vsel %vm492_vm0, %v441_v16, 0.0  ;;  %v1180_v25 = vsel %vm492_vm0, %v431_v17, 0.0  ;;  %v412_v31 = vld [vmem:[%s3836_s19 + $0x1a4] sm:$0x3] }
 0x166   : > { %v2371_v38 = vrot.slane %v1465_v33, %v3984_v23  ;;  %v2367_v39 = vrot.slane %v1464_v34, %v3984_v23  ;;  %1235 = vadd.xlane.f32.xlu1 %v1234_v29  ;;  %1205 = vadd.xlane.f32.xlu0 %v1204_v30  ;;  %v422_v30 = vld [vmem:[%s3836_s19 + $0x1b8] sm:$0x3] }
 0x167   : > { %v804_v40 = vpop.xlane.xlu1 %803  ;;  %v801_v43 = vpop.xlane.xlu0 %800 }
 0x168   : > { %v3218_v46 = vsel %vm3130_vm4, %v2367_v39, %v3217_v37  ;;  %v1467_v47 = vmul.f32 0.0625, %v804_v40  ;;  %v1466_v48 = vmul.f32 0.0625, %v801_v43  ;;  %v1123_v39 = vsel %vm492_vm0, %v412_v31, 0.0 }
 0x169   : > { %v3219_v51 = vsel %vm3132_vm5, %v2371_v38, %v3218_v46  ;;  %v1153_v38 = vsel %vm492_vm0, %v422_v30, 0.0  ;;  %v432_v46 = vld [vmem:[%s3836_s19 + $0x1cc] sm:$0x3] }
 0x16a   : > { %v2379_v53 = vrot.slane %v1467_v47, %v3984_v23  ;;  %v2375_v54 = vrot.slane %v1466_v48, %v3984_v23  ;;  %1178 = vadd.xlane.f32.xlu1 %v1177_v44  ;;  %1148 = vadd.xlane.f32.xlu0 %v1147_v45  ;;  %v402_v45 = vld [vmem:[%s3836_s19 + $0x190] sm:$0x3] }
 0x16b   : > { %v810_v55 = vpop.xlane.xlu1 %809  ;;  %v807_v57 = vpop.xlane.xlu0 %806 }
 0x16c   : > { %v1469_v60 = vmul.f32 0.0625, %v810_v55  ;;  %v1468_v61 = vmul.f32 0.0625, %v807_v57  ;;  %v3220_v1 = vsel %vm3134_vm6, %v2375_v54, %v3219_v51  ;;  %v1183_v54 = vsel %vm492_vm0, %v432_v46, 0.0 }
 0x16d   : > { %v4413_v2 = vsel %vm3136_vm7, %v2379_v53, %v3220_v1  ;;  %v1093_v53 = vsel %vm492_vm0, %v402_v45, 0.0 }
 0x16e   : > { %v2387_v3 = vrot.slane %v1469_v60, %v3984_v23  ;;  %v2383_v4 = vrot.slane %v1468_v61, %v3984_v23  ;;  %1118 = vadd.xlane.f32.xlu1 %v1117_v58  ;;  %1208 = vadd.xlane.f32.xlu0 %v1207_v59  ;;  %v413_v58 = vld [vmem:[%s3836_s19 + $0x1a6] sm:$0x3]  ;;  %v403_v59 = vld [vmem:[%s3836_s19 + $0x192] sm:$0x3] }
 0x16f   : > { %v816_v5 = vpop.xlane.xlu1 %815  ;;  %v813_v6 = vpop.xlane.xlu0 %812 }
 0x170   : > { %v3222_v11 = vsel %vm3124_vm1, %v2387_v3, %v2383_v4  ;;  %v1471_v12 = vmul.f32 0.0625, %v816_v5  ;;  %v1470_v14 = vmul.f32 0.0625, %v813_v6  ;;  %v1126_v4 = vsel %vm492_vm0, %v413_v58, 0.0 }
 0x171   : > { %v1096_v5 = vsel %vm492_vm0, %v403_v59, 0.0 }
 0x172   : > { %v2395_v18 = vrot.slane %v1471_v12, %v3984_v23  ;;  %v2391_v19 = vrot.slane %v1470_v14, %v3984_v23  ;;  %1151 = vadd.xlane.f32.xlu1 %v1150_v9  ;;  %1121 = vadd.xlane.f32.xlu0 %v1120_v10  ;;  %v423_v12 = vld [vmem:[%s3836_s19 + $0x1ba] sm:$0x3] }
 0x173   : > { %v822_v20 = vpop.xlane.xlu1 %821  ;;  %v819_v21 = vpop.xlane.xlu0 %818 }
 0x174   : > { %v3223_v26 = vsel %vm3126_vm2, %v2391_v19, %v3222_v11  ;;  %v1473_v28 = vmul.f32 0.0625, %v822_v20  ;;  %v1472_v29 = vmul.f32 0.0625, %v819_v21  ;;  %v433_v11 = vld [vmem:[%s3836_s19 + $0x1ce] sm:$0x3]  ;;  %v1156_v20 = vsel %vm492_vm0, %v423_v12, 0.0 }
 0x175   : > { %v3224_v33 = vsel %vm3128_vm3, %v2395_v18, %v3223_v26  ;;  %v1186_v19 = vsel %vm492_vm0, %v433_v11, 0.0  ;;  %v414_v26 = vld [vmem:[%s3836_s19 + $0x1a8] sm:$0x3] }
 0x176   : > { %v2403_v34 = vrot.slane %v1473_v28, %v3984_v23  ;;  %v2399_v35 = vrot.slane %v1472_v29, %v3984_v23  ;;  %1211 = vadd.xlane.f32.xlu1 %v1210_v24  ;;  %1181 = vadd.xlane.f32.xlu0 %v1180_v25  ;;  %v404_v28 = vld [vmem:[%s3836_s19 + $0x194] sm:$0x3] }
 0x177   : > { %v828_v36 = vpop.xlane.xlu1 %827  ;;  %v825_v37 = vpop.xlane.xlu0 %824 }
 0x178   : > { %v3225_v40 = vsel %vm3130_vm4, %v2399_v35, %v3224_v33  ;;  %v1475_v43 = vmul.f32 0.0625, %v828_v36  ;;  %v1474_v44 = vmul.f32 0.0625, %v825_v37  ;;  %v1129_v35 = vsel %vm492_vm0, %v414_v26, 0.0 }
 0x179   : > { %v3226_v47 = vsel %vm3132_vm5, %v2403_v34, %v3225_v40  ;;  %v1099_v36 = vsel %vm492_vm0, %v404_v28, 0.0  ;;  %v394_v40 = vld [vmem:[%s3836_s19 + $0x180] sm:$0x3] }
 0x17a   : > { %v2411_v48 = vrot.slane %v1475_v43, %v3984_v23  ;;  %v2407_v49 = vrot.slane %v1474_v44, %v3984_v23  ;;  %1154 = vadd.xlane.f32.xlu1 %v1153_v38  ;;  %1124 = vadd.xlane.f32.xlu0 %v1123_v39  ;;  %v424_v43 = vld [vmem:[%s3836_s19 + $0x1bc] sm:$0x3] }
 0x17b   : > { %v834_v50 = vpop.xlane.xlu1 %833  ;;  %v831_v51 = vpop.xlane.xlu0 %830 }
 0x17c   : > { %v1477_v55 = vmul.f32 0.0625, %v834_v50  ;;  %v1476_v57 = vmul.f32 0.0625, %v831_v51  ;;  %v3227_v60 = vsel %vm3134_vm6, %v2407_v49, %v3226_v47  ;;  %v1069_v49 = vsel %vm492_vm0, %v394_v40, 0.0 }
 0x17d   : > { %v4446_v61 = vsel %vm3136_vm7, %v2411_v48, %v3227_v60  ;;  %v1159_v50 = vsel %vm492_vm0, %v424_v43, 0.0 }
 0x17e   : > { %v2419_v62 = vrot.slane %v1477_v55, %v3984_v23  ;;  %v2415_v63 = vrot.slane %v1476_v57, %v3984_v23  ;;  %1094 = vadd.xlane.f32.xlu1 %v1093_v53  ;;  %1184 = vadd.xlane.f32.xlu0 %v1183_v54  ;;  %v405_v54 = vld [vmem:[%s3836_s19 + $0x196] sm:$0x3]  ;;  %v395_v55 = vld [vmem:[%s3836_s19 + $0x182] sm:$0x3] }
 0x17f   : > { %v840_v1 = vpop.xlane.xlu1 %839  ;;  %v837_v3 = vpop.xlane.xlu0 %836 }
 0x180   : > { %v3229_v6 = vsel %vm3124_vm1, %v2419_v62, %v2415_v63  ;;  %v1479_v9 = vmul.f32 0.0625, %v840_v1  ;;  %v1478_v10 = vmul.f32 0.0625, %v837_v3  ;;  %v1102_v1 = vsel %vm492_vm0, %v405_v54, 0.0 }
 0x181   : > { %v1072_v3 = vsel %vm492_vm0, %v395_v55, 0.0 }
 0x182   : > { %v2427_v14 = vrot.slane %v1479_v9, %v3984_v23  ;;  %v2423_v16 = vrot.slane %v1478_v10, %v3984_v23  ;;  %1127 = vadd.xlane.f32.xlu1 %v1126_v4  ;;  %1097 = vadd.xlane.f32.xlu0 %v1096_v5  ;;  %v425_v9 = vld [vmem:[%s3836_s19 + $0x1be] sm:$0x3]  ;;  %v415_v10 = vld [vmem:[%s3836_s19 + $0x1aa] sm:$0x3] }
 0x183   : > { %v846_v17 = vpop.xlane.xlu1 %845  ;;  %v843_v18 = vpop.xlane.xlu0 %842 }
 0x184   : > { %v3230_v21 = vsel %vm3126_vm2, %v2423_v16, %v3229_v6  ;;  %v1481_v24 = vmul.f32 0.0625, %v846_v17  ;;  %v1480_v25 = vmul.f32 0.0625, %v843_v18  ;;  %v1162_v17 = vsel %vm492_vm0, %v425_v9, 0.0  ;;  %v407_v9 = vld [vmem:[%s3836_s19 + $0x19a] sm:$0x3] }
 0x185   : > { %v3231_v29 = vsel %vm3128_vm3, %v2427_v14, %v3230_v21  ;;  %v1132_v18 = vsel %vm492_vm0, %v415_v10, 0.0 }
 0x186   : > { %v2435_v30 = vrot.slane %v1481_v24, %v3984_v23  ;;  %v2431_v31 = vrot.slane %v1480_v25, %v3984_v23  ;;  %1187 = vadd.xlane.f32.xlu1 %v1186_v19  ;;  %1157 = vadd.xlane.f32.xlu0 %v1156_v20  ;;  %v406_v24 = vld [vmem:[%s3836_s19 + $0x198] sm:$0x3]  ;;  %v396_v25 = vld [vmem:[%s3836_s19 + $0x184] sm:$0x3] }
 0x187   : > { %v852_v33 = vpop.xlane.xlu1 %851  ;;  %v849_v34 = vpop.xlane.xlu0 %848 }
 0x188   : > { %v3232_v37 = vsel %vm3130_vm4, %v2431_v31, %v3231_v29  ;;  %v1483_v38 = vmul.f32 0.0625, %v852_v33  ;;  %v1482_v39 = vmul.f32 0.0625, %v849_v34  ;;  %v1105_v33 = vsel %vm492_vm0, %v406_v24, 0.0  ;;  %v388_v24 = vld [vmem:[%s3836_s19 + $0x174] sm:$0x3] }
 0x189   : > { %v3233_v44 = vsel %vm3132_vm5, %v2435_v30, %v3232_v37  ;;  %v1075_v34 = vsel %vm492_vm0, %v396_v25, 0.0  ;;  %v386_v37 = vld [vmem:[%s3836_s19 + $0x170] sm:$0x3] }
 0x18a   : > { %v2443_v45 = vrot.slane %v1483_v38, %v3984_v23  ;;  %v2439_v46 = vrot.slane %v1482_v39, %v3984_v23  ;;  %1130 = vadd.xlane.f32.xlu1 %v1129_v35  ;;  %1100 = vadd.xlane.f32.xlu0 %v1099_v36  ;;  %v416_v38 = vld [vmem:[%s3836_s19 + $0x1ac] sm:$0x3] }
 0x18b   : > { %v858_v47 = vpop.xlane.xlu1 %857  ;;  %v855_v48 = vpop.xlane.xlu0 %854 }
 0x18c   : > { %v1485_v51 = vmul.f32 0.0625, %v858_v47  ;;  %v1484_v53 = vmul.f32 0.0625, %v855_v48  ;;  %v3234_v57 = vsel %vm3134_vm6, %v2439_v46, %v3233_v44  ;;  %v1045_v47 = vsel %vm492_vm0, %v386_v37, 0.0  ;;  %v378_v37 = vld [vmem:[%s3836_s19 + $0x160] sm:$0x3] }
 0x18d   : > { %v4479_v58 = vsel %vm3136_vm7, %v2443_v45, %v3234_v57  ;;  %v1135_v48 = vsel %vm492_vm0, %v416_v38, 0.0  ;;  %v408_v38 = vld [vmem:[%s3836_s19 + $0x19c] sm:$0x3] }
 0x18e   : > { %v2451_v59 = vrot.slane %v1485_v51, %v3984_v23  ;;  %v2447_v60 = vrot.slane %v1484_v53, %v3984_v23  ;;  %1070 = vadd.xlane.f32.xlu1 %v1069_v49  ;;  %1160 = vadd.xlane.f32.xlu0 %v1159_v50  ;;  %v397_v51 = vld [vmem:[%s3836_s19 + $0x186] sm:$0x3]  ;;  %v387_v53 = vld [vmem:[%s3836_s19 + $0x172] sm:$0x3] }
 0x18f   : > { %v864_v62 = vpop.xlane.xlu1 %863  ;;  %v861_v63 = vpop.xlane.xlu0 %860 }
 0x190   : > { %v3236_v4 = vsel %vm3124_vm1, %v2451_v59, %v2447_v60  ;;  %v1487_v5 = vmul.f32 0.0625, %v864_v62  ;;  %v1486_v6 = vmul.f32 0.0625, %v861_v63  ;;  %v1078_v63 = vsel %vm492_vm0, %v397_v51, 0.0  ;;  %v379_v51 = vld [vmem:[%s3836_s19 + $0x162] sm:$0x3] }
 0x192   : > { %v2459_v11 = vrot.slane %v1487_v5, %v3984_v23  ;;  %v2455_v12 = vrot.slane %v1486_v6, %v3984_v23  ;;  %1103 = vadd.xlane.f32.xlu1 %v1102_v1  ;;  %1073 = vadd.xlane.f32.xlu0 %v1072_v3  ;;  %v1048_v1 = vsel %vm492_vm0, %v387_v53, 0.0  ;;  %v417_v6 = vld [vmem:[%s3836_s19 + $0x1ae] sm:$0x3] }
 0x193   : > { %v870_v14 = vpop.xlane.xlu1 %869  ;;  %v867_v16 = vpop.xlane.xlu0 %866 }
 0x194   : > { %v3237_v19 = vsel %vm3126_vm2, %v2455_v12, %v3236_v4  ;;  %v1489_v20 = vmul.f32 0.0625, %v870_v14  ;;  %v1488_v21 = vmul.f32 0.0625, %v867_v16  ;;  %v1138_v16 = vsel %vm492_vm0, %v417_v6, 0.0  ;;  %v409_v6 = vld [vmem:[%s3836_s19 + $0x19e] sm:$0x3] }
 0x195   : > { %v3238_v26 = vsel %vm3128_vm3, %v2459_v11, %v3237_v19 }
 0x196   : > { %v2467_v28 = vrot.slane %v1489_v20, %v3984_v23  ;;  %v2463_v29 = vrot.slane %v1488_v21, %v3984_v23  ;;  %1163 = vadd.xlane.f32.xlu1 %v1162_v17  ;;  %1133 = vadd.xlane.f32.xlu0 %v1132_v18  ;;  %v1108_v17 = vsel %vm492_vm0, %v407_v9, 0.0  ;;  %v398_v21 = vld [vmem:[%s3836_s19 + $0x188] sm:$0x3]  ;;  %v399_v9 = vld [vmem:[%s3836_s19 + $0x18a] sm:$0x3] }
 0x197   : > { %v876_v30 = vpop.xlane.xlu1 %875  ;;  %v873_v31 = vpop.xlane.xlu0 %872 }
 0x198   : > { %v1491_v35 = vmul.f32 0.0625, %v876_v30  ;;  %v1490_v36 = vmul.f32 0.0625, %v873_v31  ;;  %v3239_v39 = vsel %vm3130_vm4, %v2463_v29, %v3238_v26  ;;  %v1081_v31 = vsel %vm492_vm0, %v398_v21, 0.0  ;;  %v390_v21 = vld [vmem:[%s3836_s19 + $0x178] sm:$0x3] }
 0x199   : > { %v3240_v40 = vsel %vm3132_vm5, %v2467_v28, %v3239_v39 }
 0x19a   : > { %v2475_v43 = vrot.slane %v1491_v35, %v3984_v23  ;;  %v2471_v44 = vrot.slane %v1490_v36, %v3984_v23  ;;  %1106 = vadd.xlane.f32.xlu1 %v1105_v33  ;;  %1076 = vadd.xlane.f32.xlu0 %v1075_v34  ;;  %v1051_v33 = vsel %vm492_vm0, %v388_v24, 0.0  ;;  %v380_v24 = vld [vmem:[%s3836_s19 + $0x164] sm:$0x3] }
 0x19b   : > { %v882_v45 = vpop.xlane.xlu1 %881  ;;  %v879_v46 = vpop.xlane.xlu0 %878 }
 0x19c   : > { %v1493_v49 = vmul.f32 0.0625, %v882_v45  ;;  %v1492_v50 = vmul.f32 0.0625, %v879_v46  ;;  %v3241_v54 = vsel %vm3134_vm6, %v2471_v44, %v3240_v40  ;;  %v1021_v46 = vsel %vm492_vm0, %v378_v37, 0.0  ;;  %v370_v37 = vld [vmem:[%s3836_s19 + $0x150] sm:$0x3] }
 0x19d   : > { %v4512_v55 = vsel %vm3136_vm7, %v2475_v43, %v3241_v54 }
 0x19e   : > { %v2483_v57 = vrot.slane %v1493_v49, %v3984_v23  ;;  %v2479_v59 = vrot.slane %v1492_v50, %v3984_v23  ;;  %1046 = vadd.xlane.f32.xlu1 %v1045_v47  ;;  %1136 = vadd.xlane.f32.xlu0 %v1135_v48  ;;  %v1111_v47 = vsel %vm492_vm0, %v408_v38, 0.0  ;;  %v389_v50 = vld [vmem:[%s3836_s19 + $0x176] sm:$0x3]  ;;  %v400_v38 = vld [vmem:[%s3836_s19 + $0x18c] sm:$0x3] }
 0x19f   : > { %v888_v60 = vpop.xlane.xlu1 %887  ;;  %v885_v62 = vpop.xlane.xlu0 %884 }
 0x1a0   : > { %v3243_v3 = vsel %vm3124_vm1, %v2483_v57, %v2479_v59  ;;  %v1495_v4 = vmul.f32 0.0625, %v888_v60  ;;  %v1494_v5 = vmul.f32 0.0625, %v885_v62 }
 0x1a2   : > { %v2491_v10 = vrot.slane %v1495_v4, %v3984_v23  ;;  %v2487_v11 = vrot.slane %v1494_v5, %v3984_v23  ;;  %1079 = vadd.xlane.f32.xlu1 %v1078_v63  ;;  %1049 = vadd.xlane.f32.xlu0 %v1048_v1  ;;  %v1054_v63 = vsel %vm492_vm0, %v389_v50, 0.0  ;;  %v1024_v1 = vsel %vm492_vm0, %v379_v51, 0.0 }
 0x1a3   : > { %v894_v12 = vpop.xlane.xlu1 %893  ;;  %v891_v14 = vpop.xlane.xlu0 %890 }
 0x1a4   : > { %v3244_v18 = vsel %vm3126_vm2, %v2487_v11, %v3243_v3  ;;  %v1497_v19 = vmul.f32 0.0625, %v894_v12  ;;  %v1496_v20 = vmul.f32 0.0625, %v891_v14 }
 0x1a5   : > { %v3245_v25 = vsel %vm3128_vm3, %v2491_v10, %v3244_v18 }
 0x1a6   : > { %v2499_v26 = vrot.slane %v1497_v19, %v3984_v23  ;;  %v2495_v28 = vrot.slane %v1496_v20, %v3984_v23  ;;  %1139 = vadd.xlane.f32.xlu1 %v1138_v16  ;;  %1109 = vadd.xlane.f32.xlu0 %v1108_v17  ;;  %v1114_v16 = vsel %vm492_vm0, %v409_v6, 0.0  ;;  %v1084_v17 = vsel %vm492_vm0, %v399_v9, 0.0  ;;  %v382_v6 = vld [vmem:[%s3836_s19 + $0x168] sm:$0x3]  ;;  %v372_v9 = vld [vmem:[%s3836_s19 + $0x154] sm:$0x3] }
 0x1a7   : > { %v900_v29 = vpop.xlane.xlu1 %899  ;;  %v897_v30 = vpop.xlane.xlu0 %896 }
 0x1a8   : > { %v3246_v34 = vsel %vm3130_vm4, %v2495_v28, %v3245_v25  ;;  %v1499_v35 = vmul.f32 0.0625, %v900_v29  ;;  %v1498_v36 = vmul.f32 0.0625, %v897_v30 }
 0x1a9   : > { %v3247_v39 = vsel %vm3132_vm5, %v2499_v26, %v3246_v34 }
 0x1aa   : > { %v2507_v40 = vrot.slane %v1499_v35, %v3984_v23  ;;  %v2503_v43 = vrot.slane %v1498_v36, %v3984_v23  ;;  %1082 = vadd.xlane.f32.xlu1 %v1081_v31  ;;  %1052 = vadd.xlane.f32.xlu0 %v1051_v33  ;;  %v1057_v31 = vsel %vm492_vm0, %v390_v21, 0.0  ;;  %v1027_v33 = vsel %vm492_vm0, %v380_v24, 0.0  ;;  %v373_v24 = vld [vmem:[%s3836_s19 + $0x156] sm:$0x3] }
 0x1ab   : > { %v906_v44 = vpop.xlane.xlu1 %905  ;;  %v903_v45 = vpop.xlane.xlu0 %902 }
 0x1ac   : > { %v1501_v48 = vmul.f32 0.0625, %v906_v44  ;;  %v1500_v49 = vmul.f32 0.0625, %v903_v45  ;;  %v3248_v53 = vsel %vm3134_vm6, %v2503_v43, %v3247_v39 }
 0x1ad   : > { %v4545_v54 = vsel %vm3136_vm7, %v2507_v40, %v3248_v53 }
 0x1ae   : > { %v2515_v57 = vrot.slane %v1501_v48, %v3984_v23  ;;  %v2511_v59 = vrot.slane %v1500_v49, %v3984_v23  ;;  %1022 = vadd.xlane.f32.xlu1 %v1021_v46  ;;  %1112 = vadd.xlane.f32.xlu0 %v1111_v47  ;;  %v997_v46 = vsel %vm492_vm0, %v370_v37, 0.0  ;;  %v1087_v47 = vsel %vm492_vm0, %v400_v38, 0.0  ;;  %v381_v48 = vld [vmem:[%s3836_s19 + $0x166] sm:$0x3]  ;;  %v371_v49 = vld [vmem:[%s3836_s19 + $0x152] sm:$0x3] }
 0x1af   : > { %v912_v60 = vpop.xlane.xlu1 %911  ;;  %v909_v62 = vpop.xlane.xlu0 %908  ;;  %v374_v38 = vld [vmem:[%s3836_s19 + $0x158] sm:$0x3] }
 0x1b0   : > { %v3250_v3 = vsel %vm3124_vm1, %v2515_v57, %v2511_v59  ;;  %v1503_v4 = vmul.f32 0.0625, %v912_v60  ;;  %v1502_v5 = vmul.f32 0.0625, %v909_v62  ;;  %v1030_v59 = vsel %vm492_vm0, %v381_v48, 0.0  ;;  %v401_v62 = vld [vmem:[%s3836_s19 + $0x18e] sm:$0x3] }
 0x1b1   : > { %v1000_v60 = vsel %vm492_vm0, %v371_v49, 0.0  ;;  %v1009_v49 = vsel %vm492_vm0, %v374_v38, 0.0  ;;  %v375_v38 = vld [vmem:[%s3836_s19 + $0x15a] sm:$0x3] }
 0x1b2   : > { %v2523_v10 = vrot.slane %v1503_v4, %v3984_v23  ;;  %v2519_v11 = vrot.slane %v1502_v5, %v3984_v23  ;;  %1055 = vadd.xlane.f32.xlu1 %v1054_v63  ;;  %1025 = vadd.xlane.f32.xlu0 %v1024_v1  ;;  %v391_v63 = vld [vmem:[%s3836_s19 + $0x17a] sm:$0x3]  ;;  %v1090_v4 = vsel %vm492_vm0, %v401_v62, 0.0  ;;  %v384_v62 = vld [vmem:[%s3836_s19 + $0x16c] sm:$0x3] }
 0x1b3   : > { %v918_v12 = vpop.xlane.xlu1 %917  ;;  %v915_v14 = vpop.xlane.xlu0 %914  ;;  %v1060_v5 = vsel %vm492_vm0, %v391_v63, 0.0 }
 0x1b4   : > { %v3251_v18 = vsel %vm3126_vm2, %v2519_v11, %v3250_v3  ;;  %v1505_v19 = vmul.f32 0.0625, %v918_v12  ;;  %v1504_v20 = vmul.f32 0.0625, %v915_v14  ;;  %v1033_v12 = vsel %vm492_vm0, %v382_v6, 0.0 }
 0x1b5   : > { %v3252_v25 = vsel %vm3128_vm3, %v2523_v10, %v3251_v18  ;;  %v1003_v14 = vsel %vm492_vm0, %v372_v9, 0.0 }
 0x1b6   : > { %v2531_v26 = vrot.slane %v1505_v19, %v3984_v23  ;;  %v2527_v28 = vrot.slane %v1504_v20, %v3984_v23  ;;  %1115 = vadd.xlane.f32.xlu1 %v1114_v16  ;;  %1085 = vadd.xlane.f32.xlu0 %v1084_v17  ;;  %v362_v16 = vld [vmem:[%s3836_s19 + $0x140] sm:$0x3]  ;;  %v392_v17 = vld [vmem:[%s3836_s19 + $0x17c] sm:$0x3] }
 0x1b7   : > { %v924_v29 = vpop.xlane.xlu1 %923  ;;  %v921_v30 = vpop.xlane.xlu0 %920  ;;  %v973_v20 = vsel %vm492_vm0, %v362_v16, 0.0  ;;  %v1063_v21 = vsel %vm492_vm0, %v392_v17, 0.0  ;;  %v355_v16 = vld [vmem:[%s3836_s19 + $0x132] sm:$0x3] }
 0x1b8   : > { %v3253_v34 = vsel %vm3130_vm4, %v2527_v28, %v3252_v25  ;;  %v1507_v35 = vmul.f32 0.0625, %v924_v29  ;;  %v1506_v36 = vmul.f32 0.0625, %v921_v30  ;;  %v363_v25 = vld [vmem:[%s3836_s19 + $0x142] sm:$0x3]  ;;  %v1006_v29 = vsel %vm492_vm0, %v373_v24, 0.0 }
 0x1b9   : > { %v3254_v39 = vsel %vm3132_vm5, %v2531_v26, %v3253_v34  ;;  %v976_v30 = vsel %vm492_vm0, %v363_v25, 0.0 }
 0x1ba   : > { %v2539_v40 = vrot.slane %v1507_v35, %v3984_v23  ;;  %v2535_v43 = vrot.slane %v1506_v36, %v3984_v23  ;;  %1058 = vadd.xlane.f32.xlu1 %v1057_v31  ;;  %1028 = vadd.xlane.f32.xlu0 %v1027_v33  ;;  %v393_v31 = vld [vmem:[%s3836_s19 + $0x17e] sm:$0x3]  ;;  %v383_v33 = vld [vmem:[%s3836_s19 + $0x16a] sm:$0x3] }
 0x1bb   : > { %v1242_v44 = vpop.xlane.xlu1 %1241  ;;  %v1239_v45 = vpop.xlane.xlu0 %1238  ;;  %v1066_v36 = vsel %vm492_vm0, %v393_v31, 0.0  ;;  %v1036_v37 = vsel %vm492_vm0, %v383_v33, 0.0  ;;  %v952_v31 = vsel %vm492_vm0, %v355_v16, 0.0 }
 0x1bc   : > { %v3255_v50 = vsel %vm3134_vm6, %v2535_v43, %v3254_v39  ;;  %v364_v39 = vld [vmem:[%s3836_s19 + $0x144] sm:$0x3]  ;;  %v1612_v43 = vmul.f32 0.0625, %v1239_v45 }
 0x1bd   : > { %v4578_v51 = vsel %vm3136_vm7, %v2539_v40, %v3255_v50  ;;  %v1613_v40 = vmul.f32 0.0625, %v1242_v44  ;;  %v979_v50 = vsel %vm492_vm0, %v364_v39, 0.0 }
 0x1be   : > { %998 = vadd.xlane.f32.xlu1 %v997_v46  ;;  %1088 = vadd.xlane.f32.xlu0 %v1087_v47  ;;  %v2959_v44 = vrot.slane %v1612_v43, %v3984_v23 }
 0x1bf   : > { %v4580_v53 = vpop.xlane.xlu1 %1214  ;;  %v1245_v57 = vpop.xlane.xlu0 %1244 }
 0x1c0   : > { %v1614_v46 = vmul.f32 0.0625, %v1245_v57 }
 0x1c2   : > { %1031 = vadd.xlane.f32.xlu1 %v1030_v59  ;;  %1001 = vadd.xlane.f32.xlu0 %v1000_v60  ;;  %v354_v60 = vld [vmem:[%s3836_s19 + $0x130] sm:$0x3]  ;;  %v2967_v57 = vrot.slane %v1614_v46, %v3984_v23 }
 0x1c3   : > { %v1248_v1 = vpop.xlane.xlu1 %1247  ;;  %v4586_v3 = vpop.xlane.xlu0 %1217 }
 0x1c4   : > { %v1615_v59 = vmul.f32 0.0625, %v1248_v1  ;;  %v949_v1 = vsel %vm492_vm0, %v354_v60, 0.0 }
 0x1c6   : > { %1091 = vadd.xlane.f32.xlu1 %v1090_v4  ;;  %1061 = vadd.xlane.f32.xlu0 %v1060_v5  ;;  %v2963_v4 = vrot.slane %v1613_v40, %v3984_v23 }
 0x1c7   : > { %v1251_v10 = vpop.xlane.xlu1 %1250  ;;  %v4592_v11 = vpop.xlane.xlu0 %1220 }
 0x1c8   : > { %v1616_v63 = vmul.f32 0.0625, %v1251_v10  ;;  %v2971_v10 = vrot.slane %v1615_v59, %v3984_v23  ;;  %v1012_v59 = vsel %vm492_vm0, %v375_v38, 0.0 }
 0x1ca   : > { %1034 = vadd.xlane.f32.xlu1 %v1033_v12  ;;  %1004 = vadd.xlane.f32.xlu0 %v1003_v14  ;;  %v1039_v12 = vsel %vm492_vm0, %v384_v62, 0.0  ;;  %v365_v14 = vld [vmem:[%s3836_s19 + $0x146] sm:$0x3]  ;;  %v2975_v17 = vrot.slane %v1616_v63, %v3984_v23  ;;  %v366_v62 = vld [vmem:[%s3836_s19 + $0x148] sm:$0x3] }
 0x1cb   : > { %v4598_v18 = vpop.xlane.xlu1 %1193  ;;  %v4600_v19 = vpop.xlane.xlu0 %1190  ;;  %v356_v63 = vld [vmem:[%s3836_s19 + $0x134] sm:$0x3] }
 0x1ce   : > { %974 = vadd.xlane.f32.xlu1 %v973_v20  ;;  %1064 = vadd.xlane.f32.xlu0 %v1063_v21  ;;  %v3348_v20 = vsel %vm3124_vm1, %v2963_v4, %v2959_v44  ;;  %v1605_v4 = vmul.f32 0.0625, %v4586_v3  ;;  %v1606_v44 = vmul.f32 0.0625, %v4592_v11  ;;  %v376_v3 = vld [vmem:[%s3836_s19 + $0x15c] sm:$0x3] }
 0x1cf   : > { %v1254_v26 = vpop.xlane.xlu1 %1253  ;;  %v4606_v28 = vpop.xlane.xlu0 %1223  ;;  %v3349_v24 = vsel %vm3126_vm2, %v2967_v57, %v3348_v20 }
 0x1d0   : > { %v1617_v45 = vmul.f32 0.0625, %v1254_v26  ;;  %v3350_v33 = vsel %vm3128_vm3, %v2971_v10, %v3349_v24  ;;  %v1607_v10 = vmul.f32 0.0625, %v4606_v28  ;;  %v2931_v11 = vrot.slane %v1605_v4, %v3984_v23 }
 0x1d1   : > { %v3351_v39 = vsel %vm3130_vm4, %v2975_v17, %v3350_v33  ;;  %v2935_v17 = vrot.slane %v1606_v44, %v3984_v23  ;;  %v1015_v28 = vsel %vm492_vm0, %v376_v3, 0.0  ;;  %v348_v3 = vld [vmem:[%s3836_s19 + $0x124] sm:$0x3] }
 0x1d2   : > { %1007 = vadd.xlane.f32.xlu1 %v1006_v29  ;;  %977 = vadd.xlane.f32.xlu0 %v976_v30  ;;  %v2979_v21 = vrot.slane %v1617_v45, %v3984_v23  ;;  %v982_v30 = vsel %vm492_vm0, %v365_v14, 0.0  ;;  %v346_v14 = vld [vmem:[%s3836_s19 + $0x120] sm:$0x3] }
 0x1d3   : > { %v4612_v34 = vpop.xlane.xlu1 %1226  ;;  %v4614_v35 = vpop.xlane.xlu0 %1196 }
 0x1d4   : > { %v3352_v43 = vsel %vm3132_vm5, %v2979_v21, %v3351_v39  ;;  %v1608_v16 = vmul.f32 0.0625, %v4612_v34  ;;  %v2939_v34 = vrot.slane %v1607_v10, %v3984_v23 }
 0x1d6   : > { %1067 = vadd.xlane.f32.xlu1 %v1066_v36  ;;  %1037 = vadd.xlane.f32.xlu0 %v1036_v37  ;;  %v385_v37 = vld [vmem:[%s3836_s19 + $0x16e] sm:$0x3] }
 0x1d7   : > { %v4620_v47 = vpop.xlane.xlu1 %1166  ;;  %v1257_v48 = vpop.xlane.xlu0 %1256 }
 0x1d8   : > { %v1618_v5 = vmul.f32 0.0625, %v1257_v48 }
 0x1da   : > { %1010 = vadd.xlane.f32.xlu1 %v1009_v49  ;;  %980 = vadd.xlane.f32.xlu0 %v979_v50  ;;  %v2983_v25 = vrot.slane %v1618_v5, %v3984_v23  ;;  %v1042_v50 = vsel %vm492_vm0, %v385_v37, 0.0  ;;  %v985_v5 = vsel %vm492_vm0, %v366_v62, 0.0 }
 0x1db   : > { %v4629_v6 = vpop.xlane.xlu1 %1199  ;;  %v4631_v9 = vpop.xlane.xlu0 %1169 }
 0x1dc   : > { %v3353_v49 = vsel %vm3134_vm6, %v2983_v25, %v3352_v43 }
 0x1de   : > { %950 = vadd.xlane.f32.xlu1 %v949_v1  ;;  %1040 = vadd.xlane.f32.xlu0 %v1039_v12  ;;  %v955_v1 = vsel %vm492_vm0, %v356_v63, 0.0  ;;  %v1604_v12 = vmul.f32 0.0625, %v4580_v53  ;;  %v925_v53 = vsel %vm492_vm0, %v346_v14, 0.0  ;;  %v358_v14 = vld [vmem:[%s3836_s19 + $0x138] sm:$0x3] }
 0x1df   : > { %v1260_v26 = vpop.xlane.xlu1 %1259  ;;  %v1230_v29 = vpop.xlane.xlu0 %1229 }
 0x1e0   : > { %v1619_v36 = vmul.f32 0.0625, %v1260_v26  ;;  %v2927_v25 = vrot.slane %v1604_v12, %v3984_v23  ;;  %v357_v26 = vld [vmem:[%s3836_s19 + $0x136] sm:$0x3] }
 0x1e2   : > { %v2987_v40 = vrot.slane %v1619_v36, %v3984_v23  ;;  %983 = vadd.xlane.f32.xlu1 %v982_v30  ;;  %953 = vadd.xlane.f32.xlu0 %v952_v31  ;;  %v2943_v30 = vrot.slane %v1608_v16, %v3984_v23  ;;  %v3341_v31 = vsel %vm3124_vm1, %v2931_v11, %v2927_v25  ;;  %v1597_v16 = vmul.f32 0.0625, %v4598_v18  ;;  %v368_v18 = vld [vmem:[%s3836_s19 + $0x14c] sm:$0x3] }
 0x1e3   : > { %v4651_v46 = vpop.xlane.xlu1 %1202  ;;  %v4653_v48 = vpop.xlane.xlu0 %1172  ;;  %v3342_v36 = vsel %vm3126_vm2, %v2935_v17, %v3341_v31  ;;  %v1596_v11 = vmul.f32 0.0625, %v4600_v19  ;;  %v1599_v25 = vmul.f32 0.0625, %v4629_v6 }
 0x1e4   : > { %v3354_v60 = vsel %vm3136_vm7, %v2987_v40, %v3353_v49  ;;  %v958_v40 = vsel %vm492_vm0, %v357_v26, 0.0  ;;  %v3343_v49 = vsel %vm3128_vm3, %v2939_v34, %v3342_v36  ;;  %v349_v34 = vld [vmem:[%s3836_s19 + $0x126] sm:$0x3]  ;;  %v1600_v19 = vmul.f32 0.0625, %v4651_v46 }
 0x1e5   : > { %3681 = vmatprep.subr.mxu0 %v3354_v60  ;;  %v367_v60 = vld [vmem:[%s3836_s19 + $0x14a] sm:$0x3]  ;;  %v3344_v62 = vsel %vm3130_vm4, %v2943_v30, %v3343_v49  ;;  %v2899_v26 = vrot.slane %v1597_v16, %v3984_v23  ;;  %v934_v6 = vsel %vm492_vm0, %v349_v34, 0.0  ;;  %v991_v36 = vsel %vm492_vm0, %v368_v18, 0.0 }
 0x1e6   : > { %1043 = vadd.xlane.f32.xlu1 %v1042_v50  ;;  %1013 = vadd.xlane.f32.xlu0 %v1012_v59  ;;  %v377_v59 = vld [vmem:[%s3836_s19 + $0x15e] sm:$0x3]  ;;  %v988_v12 = vsel %vm492_vm0, %v367_v60, 0.0  ;;  %v2907_v46 = vrot.slane %v1599_v25, %v3984_v23  ;;  %v351_v34 = vld [vmem:[%s3836_s19 + $0x12a] sm:$0x3]  ;;  %v1589_v18 = vmul.f32 0.0625, %v4631_v9 }
 0x1e7   : > { %3682 = vmatpush3.msra.mxu0 %v4512_v55  ;;  %v4664_v45 = vpop.xlane.xlu1 %1142  ;;  %v1233_v57 = vpop.xlane.xlu0 %1232  ;;  %v1609_v55 = vmul.f32 0.0625, %v1230_v29  ;;  %v347_v29 = vld [vmem:[%s3836_s19 + $0x122] sm:$0x3]  ;;  %v361_v25 = vld [vmem:[%s3836_s19 + $0x13e] sm:$0x3] }
 0x1e8   : > { %v1610_v20 = vmul.f32 0.0625, %v1233_v57  ;;  %v928_v43 = vsel %vm492_vm0, %v347_v29, 0.0  ;;  %v352_v9 = vld [vmem:[%s3836_s19 + $0x12c] sm:$0x3] }
 0x1e9   : > { %v2947_v33 = vrot.slane %v1609_v55, %v3984_v23  ;;  %v1598_v55 = vmul.f32 0.0625, %v4614_v35  ;;  %v2895_v35 = vrot.slane %v1596_v11, %v3984_v23 }
 0x1ea   : > { %986 = vadd.xlane.f32.xlu1 %v985_v5  ;;  %956 = vadd.xlane.f32.xlu0 %v955_v1  ;;  %v2951_v37 = vrot.slane %v1610_v20, %v3984_v23  ;;  %v1018_v1 = vsel %vm492_vm0, %v377_v59, 0.0 }
 0x1eb   : > { %v4675_v21 = vpop.xlane.xlu1 %1175  ;;  %v4677_v24 = vpop.xlane.xlu0 %1145  ;;  %v3345_v4 = vsel %vm3132_vm5, %v2947_v33, %v3344_v62  ;;  %v2903_v29 = vrot.slane %v1598_v55, %v3984_v23 }
 0x1ec   : > { %v3346_v5 = vsel %vm3134_vm6, %v2951_v37, %v3345_v4  ;;  %v369_v37 = vld [vmem:[%s3836_s19 + $0x14e] sm:$0x3] }
 0x1ed   : > { %v994_v62 = vsel %vm492_vm0, %v369_v37, 0.0 }
 0x1ee   : > { %926 = vadd.xlane.f32.xlu1 %v925_v53  ;;  %1016 = vadd.xlane.f32.xlu0 %v1015_v28  ;;  %v961_v53 = vsel %vm492_vm0, %v358_v14, 0.0  ;;  %v931_v28 = vsel %vm492_vm0, %v348_v3, 0.0 }
 0x1ef   : > { %v1236_v38 = vpop.xlane.xlu1 %1235  ;;  %v1206_v39 = vpop.xlane.xlu0 %1205 }
 0x1f0   : > { %v1611_v50 = vmul.f32 0.0625, %v1236_v38  ;;  %v359_v38 = vld [vmem:[%s3836_s19 + $0x13a] sm:$0x3] }
 0x1f2   : > { %v2955_v63 = vrot.slane %v1611_v50, %v3984_v23  ;;  %959 = vadd.xlane.f32.xlu1 %v958_v40  ;;  %929 = vadd.xlane.f32.xlu0 %v928_v43  ;;  %v3334_v40 = vsel %vm3124_vm1, %v2899_v26, %v2895_v35 }
 0x1f3   : > { %v4698_v44 = vpop.xlane.xlu1 %1178  ;;  %v4700_v57 = vpop.xlane.xlu0 %1148  ;;  %v3335_v49 = vsel %vm3126_vm2, %v2903_v29, %v3334_v40  ;;  %v940_v29 = vsel %vm492_vm0, %v351_v34, 0.0 }
 0x1f4   : > { %v3347_v10 = vsel %vm3136_vm7, %v2955_v63, %v3346_v5  ;;  %v964_v63 = vsel %vm492_vm0, %v359_v38, 0.0  ;;  %v3336_v4 = vsel %vm3128_vm3, %v2907_v46, %v3335_v49  ;;  %v1592_v46 = vmul.f32 0.0625, %v4698_v44  ;;  %v483_v49 = vld [vmem:[%s3836_s19 + $0x232] sm:$0x3] }
 0x1f5   : > { %3683 = vmatprep.subr.mxu0 %v3347_v10 }
 0x1f6   : > { %1019 = vadd.xlane.f32.xlu1 %v1018_v1  ;;  %989 = vadd.xlane.f32.xlu0 %v988_v12  ;;  %v360_v1 = vld [vmem:[%s3836_s19 + $0x13c] sm:$0x3]  ;;  %v350_v12 = vld [vmem:[%s3836_s19 + $0x128] sm:$0x3] }
 0x1f7   : > { %3684 = vmatpush3.msra.mxu0 %v4479_v58  ;;  %v4712_v17 = vpop.xlane.xlu1 %1118  ;;  %v1209_v20 = vpop.xlane.xlu0 %1208  ;;  %v1601_v58 = vmul.f32 0.0625, %v1206_v39  ;;  %v2911_v39 = vrot.slane %v1600_v19, %v3984_v23  ;;  %v1590_v19 = vmul.f32 0.0625, %v4653_v48  ;;  %v2867_v48 = vrot.slane %v1589_v18, %v3984_v23 }
 0x1f8   : > { %v1602_v30 = vmul.f32 0.0625, %v1209_v20  ;;  %v967_v20 = vsel %vm492_vm0, %v360_v1, 0.0 }
 0x1f9   : > { %v2915_v43 = vrot.slane %v1601_v58, %v3984_v23  ;;  %v3337_v10 = vsel %vm3130_vm4, %v2911_v39, %v3336_v4  ;;  %v970_v58 = vsel %vm492_vm0, %v361_v25, 0.0  ;;  %v2871_v37 = vrot.slane %v1590_v19, %v3984_v23 }
 0x1fa   : > { %962 = vadd.xlane.f32.xlu1 %v961_v53  ;;  %932 = vadd.xlane.f32.xlu0 %v931_v28  ;;  %v2919_v50 = vrot.slane %v1602_v30, %v3984_v23  ;;  %v937_v53 = vsel %vm492_vm0, %v350_v12, 0.0  ;;  %v1588_v30 = vmul.f32 0.0625, %v4620_v47  ;;  %v1336_v12 = vsel %vm492_vm0, %v483_v49, 0.0 }
 0x1fb   : > { %v4723_v31 = vpop.xlane.xlu1 %1151  ;;  %v4725_v33 = vpop.xlane.xlu0 %1121  ;;  %v3338_v3 = vsel %vm3132_vm5, %v2915_v43, %v3337_v10 }
 0x1fc   : > { %v3339_v55 = vsel %vm3134_vm6, %v2919_v50, %v3338_v3  ;;  %v2863_v43 = vrot.slane %v1588_v30, %v3984_v23  ;;  %v482_v50 = vld [vmem:[%s3836_s19 + $0x230] sm:$0x3]  ;;  %v485_v30 = vld [vmem:[%s3836_s19 + $0x236] sm:$0x3] }
 0x1fd   : > { %v1333_v10 = vsel %vm492_vm0, %v482_v50, 0.0 }
 0x1fe   : > { %935 = vadd.xlane.f32.xlu1 %v934_v6  ;;  %992 = vadd.xlane.f32.xlu0 %v991_v36  ;;  %v1591_v6 = vmul.f32 0.0625, %v4675_v21  ;;  %v353_v36 = vld [vmem:[%s3836_s19 + $0x12e] sm:$0x3]  ;;  %v943_v21 = vsel %vm492_vm0, %v352_v9, 0.0  ;;  %v1582_v9 = vmul.f32 0.0625, %v4700_v57 }
 0x1ff   : > { %v1212_v59 = vpop.xlane.xlu1 %1211  ;;  %v1182_v60 = vpop.xlane.xlu0 %1181  ;;  %v946_v47 = vsel %vm492_vm0, %v353_v36, 0.0  ;;  %v1581_v36 = vmul.f32 0.0625, %v4677_v24  ;;  %v476_v24 = vld [vmem:[%s3836_s19 + $0x224] sm:$0x3] }
 0x200   : > { %v1603_v5 = vmul.f32 0.0625, %v1212_v59  ;;  %v2875_v44 = vrot.slane %v1591_v6, %v3984_v23  ;;  %v2879_v59 = vrot.slane %v1592_v46, %v3984_v23  ;;  %v475_v6 = vld [vmem:[%s3836_s19 + $0x222] sm:$0x3] }
 0x201   : > { %v2835_v57 = vrot.slane %v1581_v36, %v3984_v23 }
 0x202   : > { %v2923_v14 = vrot.slane %v1603_v5, %v3984_v23  ;;  %995 = vadd.xlane.f32.xlu1 %v994_v62  ;;  %965 = vadd.xlane.f32.xlu0 %v964_v63 }
 0x203   : > { %v4745_v16 = vpop.xlane.xlu1 %1154  ;;  %v4747_v11 = vpop.xlane.xlu0 %1124 }
 0x204   : > { %v3340_v28 = vsel %vm3136_vm7, %v2923_v14, %v3339_v55  ;;  %v474_v55 = vld [vmem:[%s3836_s19 + $0x220] sm:$0x3] }
 0x205   : > { %3685 = vmatprep.subr.mxu0 %v3340_v28 }
 0x206   : > { %968 = vadd.xlane.f32.xlu1 %v967_v20  ;;  %938 = vadd.xlane.f32.xlu0 %v937_v53  ;;  %v484_v20 = vld [vmem:[%s3836_s19 + $0x234] sm:$0x3] }
 0x207   : > { %3686 = vmatpush3.msra.mxu0 %v4446_v61  ;;  %v4758_v26 = vpop.xlane.xlu1 %1094  ;;  %v1185_v35 = vpop.xlane.xlu0 %1184  ;;  %v1593_v61 = vmul.f32 0.0625, %v1182_v60  ;;  %v3327_v60 = vsel %vm3124_vm1, %v2867_v48, %v2863_v43  ;;  %v1584_v43 = vmul.f32 0.0625, %v4745_v16 }
 0x208   : > { %v1594_v38 = vmul.f32 0.0625, %v1185_v35  ;;  %v3328_v63 = vsel %vm3126_vm2, %v2871_v37, %v3327_v60  ;;  %v1309_v35 = vsel %vm492_vm0, %v474_v55, 0.0  ;;  %v1312_v37 = vsel %vm492_vm0, %v475_v6, 0.0 }
 0x209   : > { %v2883_v62 = vrot.slane %v1593_v61, %v3984_v23  ;;  %v3329_v14 = vsel %vm3128_vm3, %v2875_v44, %v3328_v63  ;;  %v1342_v61 = vsel %vm492_vm0, %v485_v30, 0.0  ;;  %v2839_v44 = vrot.slane %v1582_v9, %v3984_v23  ;;  %v466_v63 = vld [vmem:[%s3836_s19 + $0x210] sm:$0x3] }
 0x20a   : > { %971 = vadd.xlane.f32.xlu1 %v970_v58  ;;  %941 = vadd.xlane.f32.xlu0 %v940_v29  ;;  %v2887_v4 = vrot.slane %v1594_v38, %v3984_v23  ;;  %v3330_v53 = vsel %vm3130_vm4, %v2879_v59, %v3329_v14  ;;  %v1339_v58 = vsel %vm492_vm0, %v484_v20, 0.0  ;;  %v1580_v38 = vmul.f32 0.0625, %v4664_v45 }
 0x20b   : > { %v4769_v39 = vpop.xlane.xlu1 %1127  ;;  %v4771_v40 = vpop.xlane.xlu0 %1097  ;;  %v3331_v25 = vsel %vm3132_vm5, %v2883_v62, %v3330_v53  ;;  %v467_v62 = vld [vmem:[%s3836_s19 + $0x212] sm:$0x3]  ;;  %v1285_v20 = vsel %vm492_vm0, %v466_v63, 0.0 }
 0x20c   : > { %v3332_v19 = vsel %vm3134_vm6, %v2887_v4, %v3331_v25  ;;  %v2831_v60 = vrot.slane %v1580_v38, %v3984_v23  ;;  %v2847_v4 = vrot.slane %v1584_v43, %v3984_v23  ;;  %v1288_v55 = vsel %vm492_vm0, %v467_v62, 0.0  ;;  %v487_v25 = vld [vmem:[%s3836_s19 + $0x23a] sm:$0x3]  ;;  %v490_v38 = vld [vmem:[%s3836_s19 + $0x240] sm:$0x3] }
 0x20d   : > { %v1348_v9 = vsel %vm492_vm0, %v487_v25, 0.0 }
 0x20e   : > { %947 = vadd.xlane.f32.xlu1 %v946_v47  ;;  %944 = vadd.xlane.f32.xlu0 %v943_v21  ;;  %v1583_v47 = vmul.f32 0.0625, %v4723_v31  ;;  %v486_v21 = vld [vmem:[%s3836_s19 + $0x238] sm:$0x3]  ;;  %v1315_v31 = vsel %vm492_vm0, %v476_v24, 0.0 }
 0x20f   : > { %v1188_v5 = vpop.xlane.xlu1 %1187  ;;  %v1158_v1 = vpop.xlane.xlu0 %1157  ;;  %v1345_v45 = vsel %vm492_vm0, %v486_v21, 0.0  ;;  %v1574_v21 = vmul.f32 0.0625, %v4747_v11 }
 0x210   : > { %v1595_v3 = vmul.f32 0.0625, %v1188_v5  ;;  %v2843_v16 = vrot.slane %v1583_v47, %v3984_v23  ;;  %v3320_v5 = vsel %vm3124_vm1, %v2835_v57, %v2831_v60  ;;  %v1573_v47 = vmul.f32 0.0625, %v4725_v33  ;;  %v468_v33 = vld [vmem:[%s3836_s19 + $0x214] sm:$0x3] }
 0x211   : > { %v2807_v60 = vrot.slane %v1574_v21, %v3984_v23 }
 0x212   : > { %v2891_v28 = vrot.slane %v1595_v3, %v3984_v23  ;;  %1337 = vadd.xlane.f32.xlu1 %v1336_v12  ;;  %1334 = vadd.xlane.f32.xlu0 %v1333_v10  ;;  %v3321_v12 = vsel %vm3126_vm2, %v2839_v44, %v3320_v5  ;;  %v1572_v44 = vmul.f32 0.0625, %v4712_v17  ;;  %v2803_v11 = vrot.slane %v1573_v47, %v3984_v23  ;;  %v458_v5 = vld [vmem:[%s3836_s19 + $0x200] sm:$0x3] }
 0x213   : > { %v4792_v34 = vpop.xlane.xlu1 %1130  ;;  %v4794_v18 = vpop.xlane.xlu0 %1100  ;;  %v3322_v53 = vsel %vm3128_vm3, %v2843_v16, %v3321_v12 }
 0x214   : > { %v3333_v29 = vsel %vm3136_vm7, %v2891_v28, %v3332_v19  ;;  %v477_v19 = vld [vmem:[%s3836_s19 + $0x226] sm:$0x3] }
 0x215   : > { %3687 = vmatprep.subr.mxu0 %v3333_v29 }
 0x216   : > { %1310 = vadd.xlane.f32.xlu1 %v1309_v35  ;;  %1340 = vadd.xlane.f32.xlu0 %v1339_v58  ;;  %v3323_v35 = vsel %vm3130_vm4, %v2847_v4, %v3322_v53  ;;  %v2799_v4 = vrot.slane %v1572_v44, %v3984_v23  ;;  %v1565_v44 = vmul.f32 0.0625, %v4771_v40  ;;  %v460_v40 = vld [vmem:[%s3836_s19 + $0x204] sm:$0x3] }
 0x217   : > { %3688 = vmatpush3.msra.mxu0 %v4413_v2  ;;  %v4805_v46 = vpop.xlane.xlu1 %1070  ;;  %v1161_v48 = vpop.xlane.xlu0 %1160  ;;  %v1585_v2 = vmul.f32 0.0625, %v1158_v1 }
 0x218   : > { %v1586_v49 = vmul.f32 0.0625, %v1161_v48  ;;  %v1318_v48 = vsel %vm492_vm0, %v477_v19, 0.0 }
 0x219   : > { %v2851_v1 = vrot.slane %v1585_v2, %v3984_v23  ;;  %v1357_v2 = vsel %vm492_vm0, %v490_v38, 0.0 }
 0x21a   : > { %1343 = vadd.xlane.f32.xlu1 %v1342_v61  ;;  %1313 = vadd.xlane.f32.xlu0 %v1312_v37  ;;  %v2855_v10 = vrot.slane %v1586_v49, %v3984_v23  ;;  %v491_v37 = vld [vmem:[%s3836_s19 + $0x242] sm:$0x3]  ;;  %v1575_v49 = vmul.f32 0.0625, %v4769_v39  ;;  %v1291_v39 = vsel %vm492_vm0, %v468_v33, 0.0 }
 0x21b   : > { %v4816_v50 = vpop.xlane.xlu1 %1103  ;;  %v4818_v59 = vpop.xlane.xlu0 %1073  ;;  %v3324_v29 = vsel %vm3132_vm5, %v2851_v1, %v3323_v35  ;;  %v1360_v57 = vsel %vm492_vm0, %v491_v37, 0.0  ;;  %v488_v1 = vld [vmem:[%s3836_s19 + $0x23c] sm:$0x3] }
 0x21c   : > { %v3325_v36 = vsel %vm3134_vm6, %v2855_v10, %v3324_v29  ;;  %v3313_v10 = vsel %vm3124_vm1, %v2803_v11, %v2799_v4  ;;  %v1351_v25 = vsel %vm492_vm0, %v488_v1, 0.0  ;;  %v459_v29 = vld [vmem:[%s3836_s19 + $0x202] sm:$0x3] }
 0x21d   : > { %v1264_v21 = vsel %vm492_vm0, %v459_v29, 0.0 }
 0x21e   : > { %1346 = vadd.xlane.f32.xlu1 %v1345_v45  ;;  %1316 = vadd.xlane.f32.xlu0 %v1315_v31  ;;  %v478_v45 = vld [vmem:[%s3836_s19 + $0x228] sm:$0x3]  ;;  %v1576_v31 = vmul.f32 0.0625, %v4792_v34  ;;  %v2811_v34 = vrot.slane %v1575_v49, %v3984_v23  ;;  %v1566_v49 = vmul.f32 0.0625, %v4794_v18  ;;  %v2771_v18 = vrot.slane %v1565_v44, %v3984_v23 }
 0x21f   : > { %v1164_v14 = vpop.xlane.xlu1 %1163  ;;  %v1134_v3 = vpop.xlane.xlu0 %1133  ;;  %v1321_v17 = vsel %vm492_vm0, %v478_v45, 0.0 }
 0x220   : > { %v1587_v28 = vmul.f32 0.0625, %v1164_v14  ;;  %v2815_v12 = vrot.slane %v1576_v31, %v3984_v23 }
 0x222   : > { %v2859_v58 = vrot.slane %v1587_v28, %v3984_v23  ;;  %1289 = vadd.xlane.f32.xlu1 %v1288_v55  ;;  %1286 = vadd.xlane.f32.xlu0 %v1285_v20  ;;  %v1261_v28 = vsel %vm492_vm0, %v458_v5, 0.0 }
 0x223   : > { %v4839_v30 = vpop.xlane.xlu1 %1106  ;;  %v4841_v6 = vpop.xlane.xlu0 %1076 }
 0x224   : > { %v3326_v61 = vsel %vm3136_vm7, %v2859_v58, %v3325_v36  ;;  %v469_v58 = vld [vmem:[%s3836_s19 + $0x216] sm:$0x3] }
 0x225   : > { %3689 = vmatprep.subr.mxu0 %v3326_v61  ;;  %v1294_v47 = vsel %vm492_vm0, %v469_v58, 0.0 }
 0x226   : > { %1349 = vadd.xlane.f32.xlu1 %v1348_v9  ;;  %1319 = vadd.xlane.f32.xlu0 %v1318_v48 }
 0x227   : > { %3690 = vmatpush3.msra.mxu0 %v4380_v7  ;;  %v4852_v24 = vpop.xlane.xlu1 %1046  ;;  %v1137_v43 = vpop.xlane.xlu0 %1136  ;;  %v1577_v7 = vmul.f32 0.0625, %v1134_v3  ;;  %v3314_v3 = vsel %vm3126_vm2, %v2807_v60, %v3313_v10  ;;  %v1567_v60 = vmul.f32 0.0625, %v4816_v50  ;;  %v1267_v50 = vsel %vm492_vm0, %v460_v40, 0.0  ;;  %v480_v10 = vld [vmem:[%s3836_s19 + $0x22c] sm:$0x3] }
 0x228   : > { %v1578_v16 = vmul.f32 0.0625, %v1137_v43  ;;  %v3315_v19 = vsel %vm3128_vm3, %v2811_v34, %v3314_v3 }
 0x229   : > { %v2819_v14 = vrot.slane %v1577_v7, %v3984_v23  ;;  %v3316_v36 = vsel %vm3130_vm4, %v2815_v12, %v3315_v19  ;;  %v1564_v7 = vmul.f32 0.0625, %v4758_v26  ;;  %v461_v12 = vld [vmem:[%s3836_s19 + $0x206] sm:$0x3] }
 0x22a   : > { %1361 = vadd.xlane.f32.xlu1 %v1360_v57  ;;  %1358 = vadd.xlane.f32.xlu0 %v1357_v2  ;;  %v2823_v55 = vrot.slane %v1578_v16, %v3984_v23  ;;  %v489_v57 = vld [vmem:[%s3836_s19 + $0x23e] sm:$0x3]  ;;  %v479_v2 = vld [vmem:[%s3836_s19 + $0x22a] sm:$0x3]  ;;  %v470_v16 = vld [vmem:[%s3836_s19 + $0x218] sm:$0x3] }
 0x22b   : > { %v4863_v62 = vpop.xlane.xlu1 %1079  ;;  %v4865_v63 = vpop.xlane.xlu0 %1049  ;;  %v3317_v48 = vsel %vm3132_vm5, %v2819_v14, %v3316_v36  ;;  %v1354_v31 = vsel %vm492_vm0, %v489_v57, 0.0  ;;  %v1324_v11 = vsel %vm492_vm0, %v479_v2, 0.0  ;;  %v1297_v26 = vsel %vm492_vm0, %v470_v16, 0.0  ;;  %v481_v36 = vld [vmem:[%s3836_s19 + $0x22e] sm:$0x3] }
 0x22c   : > { %v3318_v38 = vsel %vm3134_vm6, %v2823_v55, %v3317_v48  ;;  %v2767_v1 = vrot.slane %v1564_v7, %v3984_v23  ;;  %v1270_v19 = vsel %vm492_vm0, %v461_v12, 0.0  ;;  %v1330_v2 = vsel %vm492_vm0, %v481_v36, 0.0 }
 0x22d   : > { %v1558_v7 = vmul.f32 0.0625, %v4841_v6 }
 0x22e   : > { %1322 = vadd.xlane.f32.xlu1 %v1321_v17  ;;  %1292 = vadd.xlane.f32.xlu0 %v1291_v39  ;;  %v1568_v17 = vmul.f32 0.0625, %v4839_v30  ;;  %v2775_v39 = vrot.slane %v1566_v49, %v3984_v23  ;;  %v2779_v30 = vrot.slane %v1567_v60, %v3984_v23  ;;  %v3306_v3 = vsel %vm3124_vm1, %v2771_v18, %v2767_v1 }
 0x22f   : > { %v1140_v20 = vpop.xlane.xlu1 %1139  ;;  %v1110_v53 = vpop.xlane.xlu0 %1109  ;;  %v1556_v18 = vmul.f32 0.0625, %v4805_v46 }
 0x230   : > { %v1579_v35 = vmul.f32 0.0625, %v1140_v20  ;;  %v2783_v14 = vrot.slane %v1568_v17, %v3984_v23  ;;  %v3307_v20 = vsel %vm3126_vm2, %v2775_v39, %v3306_v3  ;;  %v473_v39 = vld [vmem:[%s3836_s19 + $0x21e] sm:$0x3] }
 0x231   : > { %v3308_v58 = vsel %vm3128_vm3, %v2779_v30, %v3307_v20  ;;  %v1306_v46 = vsel %vm492_vm0, %v473_v39, 0.0  ;;  %v2735_v12 = vrot.slane %v1556_v18, %v3984_v23 }
 0x232   : > { %v2827_v9 = vrot.slane %v1579_v35, %v3984_v23  ;;  %1262 = vadd.xlane.f32.xlu1 %v1261_v28  ;;  %1352 = vadd.xlane.f32.xlu0 %v1351_v25  ;;  %v1327_v35 = vsel %vm492_vm0, %v480_v10, 0.0  ;;  %v3309_v48 = vsel %vm3130_vm4, %v2783_v14, %v3308_v58  ;;  %v464_v10 = vld [vmem:[%s3836_s19 + $0x20c] sm:$0x3]  ;;  %v465_v14 = vld [vmem:[%s3836_s19 + $0x20e] sm:$0x3] }
 0x233   : > { %v4886_v61 = vpop.xlane.xlu1 %1082  ;;  %v4888_v37 = vpop.xlane.xlu0 %1052  ;;  %v1282_v58 = vsel %vm492_vm0, %v465_v14, 0.0 }
 0x234   : > { %v3319_v43 = vsel %vm3136_vm7, %v2827_v9, %v3318_v38  ;;  %v471_v9 = vld [vmem:[%s3836_s19 + $0x21a] sm:$0x3] }
 0x235   : > { %3691 = vmatprep.subr.mxu0 %v3319_v43  ;;  %v1300_v44 = vsel %vm492_vm0, %v471_v9, 0.0 }
 0x236   : > { %1295 = vadd.xlane.f32.xlu1 %v1294_v47  ;;  %1265 = vadd.xlane.f32.xlu0 %v1264_v21 }
 0x237   : > { %3692 = vmatpush3.msra.mxu0 %v4347_v15  ;;  %v4899_v45 = vpop.xlane.xlu1 %1022  ;;  %v1113_v33 = vpop.xlane.xlu0 %1112  ;;  %v1569_v15 = vmul.f32 0.0625, %v1110_v53 }
 0x238   : > { %v1570_v4 = vmul.f32 0.0625, %v1113_v33  ;;  %v472_v33 = vld [vmem:[%s3836_s19 + $0x21c] sm:$0x3] }
 0x239   : > { %v2787_v55 = vrot.slane %v1569_v15, %v3984_v23  ;;  %v1303_v40 = vsel %vm492_vm0, %v472_v33, 0.0  ;;  %v1559_v15 = vmul.f32 0.0625, %v4863_v62  ;;  %v1550_v33 = vmul.f32 0.0625, %v4888_v37 }
 0x23a   : > { %1355 = vadd.xlane.f32.xlu1 %v1354_v31  ;;  %1325 = vadd.xlane.f32.xlu0 %v1324_v11  ;;  %v2791_v53 = vrot.slane %v1570_v4, %v3984_v23  ;;  %v462_v31 = vld [vmem:[%s3836_s19 + $0x208] sm:$0x3]  ;;  %v1557_v11 = vmul.f32 0.0625, %v4818_v59  ;;  %v463_v59 = vld [vmem:[%s3836_s19 + $0x20a] sm:$0x3]  ;;  %v1560_v4 = vmul.f32 0.0625, %v4886_v61 }
 0x23b   : > { %v4910_v34 = vpop.xlane.xlu1 %1055  ;;  %v4912_v5 = vpop.xlane.xlu0 %1025  ;;  %v3310_v47 = vsel %vm3132_vm5, %v2787_v55, %v3309_v48  ;;  %v1273_v17 = vsel %vm492_vm0, %v462_v31, 0.0  ;;  %v1276_v62 = vsel %vm492_vm0, %v463_v59, 0.0  ;;  %v2747_v61 = vrot.slane %v1559_v15, %v3984_v23 }
 0x23c   : > { %v3311_v57 = vsel %vm3134_vm6, %v2791_v53, %v3310_v47  ;;  %v2739_v6 = vrot.slane %v1557_v11, %v3984_v23  ;;  %v2751_v3 = vrot.slane %v1560_v4, %v3984_v23 }
 0x23e   : > { %1298 = vadd.xlane.f32.xlu1 %v1297_v26  ;;  %1268 = vadd.xlane.f32.xlu0 %v1267_v50  ;;  %v2743_v26 = vrot.slane %v1558_v7, %v3984_v23  ;;  %v3299_v55 = vsel %vm3124_vm1, %v2739_v6, %v2735_v12  ;;  %v1548_v7 = vmul.f32 0.0625, %v4852_v24 }
 0x23f   : > { %v1116_v28 = vpop.xlane.xlu1 %1115  ;;  %v1086_v25 = vpop.xlane.xlu0 %1085 }
 0x240   : > { %v1571_v29 = vmul.f32 0.0625, %v1116_v28  ;;  %v3300_v53 = vsel %vm3126_vm2, %v2743_v26, %v3299_v55  ;;  %v2703_v24 = vrot.slane %v1548_v7, %v3984_v23 }
 0x242   : > { %v2795_v38 = vrot.slane %v1571_v29, %v3984_v23  ;;  %1271 = vadd.xlane.f32.xlu1 %v1270_v19  ;;  %1328 = vadd.xlane.f32.xlu0 %v1327_v35  ;;  %v1279_v35 = vsel %vm492_vm0, %v464_v10, 0.0  ;;  %v3301_v29 = vsel %vm3128_vm3, %v2747_v61, %v3300_v53 }
 0x243   : > { %v4933_v21 = vpop.xlane.xlu1 %1058  ;;  %v4935_v43 = vpop.xlane.xlu0 %1028  ;;  %v3302_v9 = vsel %vm3130_vm4, %v2751_v3, %v3301_v29 }
 0x244   : > { %v3312_v49 = vsel %vm3136_vm7, %v2795_v38, %v3311_v57 }
 0x245   : > { %3693 = vmatprep.subr.mxu0 %v3312_v49  ;;  %v1549_v49 = vmul.f32 0.0625, %v4865_v63 }
 0x246   : > { %1331 = vadd.xlane.f32.xlu1 %v1330_v2  ;;  %1301 = vadd.xlane.f32.xlu0 %v1300_v44 }
 0x247   : > { %3694 = vmatpush3.msra.mxu0 %v4314_v22  ;;  %v4946_v60 = vpop.xlane.xlu1 %998  ;;  %v1089_v16 = vpop.xlane.xlu0 %1088  ;;  %v1561_v22 = vmul.f32 0.0625, %v1086_v25  ;;  %v2707_v18 = vrot.slane %v1549_v49, %v3984_v23 }
 0x248   : > { %v1562_v50 = vmul.f32 0.0625, %v1089_v16  ;;  %v1551_v16 = vmul.f32 0.0625, %v4910_v34 }
 0x249   : > { %v2755_v20 = vrot.slane %v1561_v22, %v3984_v23  ;;  %v3292_v59 = vsel %vm3124_vm1, %v2707_v18, %v2703_v24 }
 0x24a   : > { %1304 = vadd.xlane.f32.xlu1 %v1303_v40  ;;  %1274 = vadd.xlane.f32.xlu0 %v1273_v17  ;;  %v2759_v28 = vrot.slane %v1562_v50, %v3984_v23  ;;  %v1552_v40 = vmul.f32 0.0625, %v4933_v21  ;;  %v1655_v17 = vld [vmem:[%s5228_s1 + $0x8] sm:$0xff]  ;;  %v2715_v34 = vrot.slane %v1551_v16, %v3984_v23 }
 0x24b   : > { %v4957_v1 = vpop.xlane.xlu1 %1031  ;;  %v4959_v30 = vpop.xlane.xlu0 %1001  ;;  %v3303_v38 = vsel %vm3132_vm5, %v2755_v20, %v3302_v9  ;;  %3494 = vmatprep.mubr.f32.mxu0 %v1655_v17  ;;  %v1656_v20 = vld [vmem:[%s5228_s1 + $0x10] sm:$0xff]  ;;  %v1540_v9 = vmul.f32 0.0625, %v4899_v45 }
 0x24c   : > { %v3304_v2 = vsel %vm3134_vm6, %v2759_v28, %v3303_v38  ;;  %v2719_v21 = vrot.slane %v1552_v40, %v3984_v23  ;;  %3736 = vmatprep.mubr.msk.f32.mxu1 %vm3420_vm8, %v1656_v20  ;;  %v1660_v28 = vld [vmem:[%s5229_s2] sm:$0xff] }
 0x24e   : > { %1307 = vadd.xlane.f32.xlu1 %v1306_v46  ;;  %1277 = vadd.xlane.f32.xlu0 %v1276_v62 }
 0x24f   : > { %v1092_v25 = vpop.xlane.xlu1 %1091  ;;  %v1062_v19 = vpop.xlane.xlu0 %1061 }
 0x250   : > { %v1563_v36 = vmul.f32 0.0625, %v1092_v25  ;;  %v1553_v63 = vmul.f32 0.0625, %v1062_v19  ;;  %v1661_v25 = vld [vmem:[%s5229_s2 + $0x8] sm:$0xf]  ;;  %v1541_v19 = vmul.f32 0.0625, %v4912_v5 }
 0x252   : > { %v2763_v48 = vrot.slane %v1563_v36, %v3984_v23  ;;  %1280 = vadd.xlane.f32.xlu0 %v1279_v35  ;;  %1283 = vadd.xlane.f32.xlu1 %v1282_v58  ;;  %v2723_v4 = vrot.slane %v1553_v63, %v3984_v23  ;;  %v3791_v35 = vmov 0   ;;  %v1542_v58 = vmul.f32 0.0625, %v4935_v43 }
 0x253   : > { %v1035_v47 = vpop.xlane.xlu1 %1034  ;;  %v4978_v57 = vpop.xlane.xlu0 %1004  ;;  %3765 = vset.pattern.permute.xlu0 %v3791_v35  ;;  %3766 = vset.pattern.permute.xlu1 %v3791_v35  ;;  %v2671_v43 = vrot.slane %v1540_v9, %v3984_v23 }
 0x254   : > { %v3305_v44 = vsel %vm3136_vm7, %v2763_v48, %v3304_v2  ;;  %v1543_v48 = vmul.f32 0.0625, %v4957_v1  ;;  %v1544_v38 = vmul.f32 0.0625, %v1035_v47  ;;  %v2675_v2 = vrot.slane %v1541_v19, %v3984_v23 }
 0x255   : > { %3695 = vmatprep.subr.mxu0 %v3305_v44 }
 0x256   : > { %3696 = vmatpush3.msra.mxu0 %v4281_v32  ;;  %v2711_v32 = vrot.slane %v1550_v33, %v3984_v23  ;;  %v2687_v45 = vrot.slane %v1544_v38, %v3984_v23  ;;  %v3285_v1 = vsel %vm3124_vm1, %v2675_v2, %v2671_v43 }
 0x257   : > { %v4985_v31 = vpop.xlane.xlu1 %974  ;;  %v1065_v11 = vpop.xlane.xlu0 %1064 }
 0x258   : > { %v1554_v37 = vmul.f32 0.0625, %v1065_v11  ;;  %v3293_v6 = vsel %vm3126_vm2, %v2711_v32, %v3292_v59  ;;  %v2683_v11 = vrot.slane %v1543_v48, %v3984_v23 }
 0x259   : > { %v3294_v46 = vsel %vm3128_vm3, %v2715_v34, %v3293_v6  ;;  %v1533_v6 = vmul.f32 0.0625, %v4959_v30 }
 0x25a   : > { %v2727_v22 = vrot.slane %v1554_v37, %v3984_v23  ;;  %v3295_v12 = vsel %vm3130_vm4, %v2719_v21, %v3294_v46  ;;  %v1532_v46 = vmul.f32 0.0625, %v4946_v60 }
 0x25b   : > { %v4995_v15 = vpop.xlane.xlu1 %1007  ;;  %v4997_v39 = vpop.xlane.xlu0 %977  ;;  %v3296_v10 = vsel %vm3132_vm5, %v2723_v4, %v3295_v12 }
 0x25c   : > { %v3297_v55 = vsel %vm3134_vm6, %v2727_v22, %v3296_v10  ;;  %v1534_v22 = vmul.f32 0.0625, %v4978_v57  ;;  %v1525_v48 = vmul.f32 0.0625, %v4997_v39 }
 0x25f   : > { %v1068_v26 = vpop.xlane.xlu1 %1067  ;;  %v1038_v50 = vpop.xlane.xlu0 %1037 }
 0x260   : > { %v1555_v62 = vmul.f32 0.0625, %v1068_v26  ;;  %v1545_v5 = vmul.f32 0.0625, %v1038_v50 }
 0x262   : > { %v2731_v61 = vrot.slane %v1555_v62, %v3984_v23  ;;  %v2691_v7 = vrot.slane %v1545_v5, %v3984_v23  ;;  %v1535_v62 = vmul.f32 0.0625, %v4995_v15 }
 0x263   : > { %v1011_v14 = vpop.xlane.xlu1 %1010  ;;  %v5010_v3 = vpop.xlane.xlu0 %980  ;;  %1669 = vperm.xlu1 %3766, %v1661_v25  }
 0x264   : > { %v3298_v53 = vsel %vm3136_vm7, %v2731_v61, %v3297_v55  ;;  %v1536_v12 = vmul.f32 0.0625, %v1011_v14  ;;  %v2643_v61 = vrot.slane %v1533_v6, %v3984_v23  ;;  %v2647_v55 = vrot.slane %v1534_v22, %v3984_v23 }
 0x265   : > { %3697 = vmatprep.subr.mxu0 %v3298_v53  ;;  %v2651_v57 = vrot.slane %v1535_v62, %v3984_v23  ;;  %v1526_v5 = vmul.f32 0.0625, %v5010_v3 }
 0x266   : > { %3698 = vmatpush3.msra.mxu0 %v4248_v42  ;;  %v2679_v42 = vrot.slane %v1542_v58, %v3984_v23 }
 0x267   : > { %v5027_v29 = vpop.xlane.xlu1 %950  ;;  %v1041_v36 = vpop.xlane.xlu0 %1040 }
 0x268   : > { %1664 = vperm.xlu0 %3765, %v1660_v28   ;;  %v1546_v44 = vmul.f32 0.0625, %v1041_v36  ;;  %v3286_v47 = vsel %vm3126_vm2, %v2679_v42, %v3285_v1  ;;  %v2655_v28 = vrot.slane %v1536_v12, %v3984_v23 }
 0x269   : > { %v3287_v18 = vsel %vm3128_vm3, %v2683_v11, %v3286_v47  ;;  %v1524_v11 = vmul.f32 0.0625, %v4985_v31  ;;  %v2611_v47 = vrot.slane %v1525_v48, %v3984_v23 }
 0x26a   : > { %v2695_v16 = vrot.slane %v1546_v44, %v3984_v23  ;;  %v3288_v32 = vsel %vm3130_vm4, %v2687_v45, %v3287_v18 }
 0x26b   : > { %v984_v49 = vpop.xlane.xlu1 %983  ;;  %v5033_v33 = vpop.xlane.xlu0 %953  ;;  %v3289_v24 = vsel %vm3132_vm5, %v2691_v7, %v3288_v32 }
 0x26c   : > { %v3290_v59 = vsel %vm3134_vm6, %v2695_v16, %v3289_v24  ;;  %v1527_v45 = vmul.f32 0.0625, %v984_v49  ;;  %v2615_v16 = vrot.slane %v1526_v5, %v3984_v23  ;;  %v1517_v32 = vmul.f32 0.0625, %v5033_v33 }
 0x26e   : > { %v2619_v18 = vrot.slane %v1527_v45, %v3984_v23  ;;  %v2579_v33 = vrot.slane %v1517_v32, %v3984_v23 }
 0x26f   : > { %v1044_v40 = vpop.xlane.xlu1 %1043  ;;  %v1014_v17 = vpop.xlane.xlu0 %1013 }
 0x270   : > { %v1547_v63 = vmul.f32 0.0625, %v1044_v40  ;;  %v1537_v10 = vmul.f32 0.0625, %v1014_v17  ;;  %v2607_v17 = vrot.slane %v1524_v11, %v3984_v23 }
 0x272   : > { %v2699_v37 = vrot.slane %v1547_v63, %v3984_v23  ;;  %v2659_v60 = vrot.slane %v1537_v10, %v3984_v23  ;;  %v3271_v49 = vsel %vm3124_vm1, %v2611_v47, %v2607_v17 }
 0x273   : > { %v987_v34 = vpop.xlane.xlu1 %986  ;;  %v957_v21 = vpop.xlane.xlu0 %956  ;;  %v3272_v24 = vsel %vm3126_vm2, %v2615_v16, %v3271_v49 }
 0x274   : > { %v3291_v4 = vsel %vm3136_vm7, %v2699_v37, %v3290_v59  ;;  %v1528_v7 = vmul.f32 0.0625, %v987_v34  ;;  %v1518_v34 = vmul.f32 0.0625, %v957_v21  ;;  %v3273_v22 = vsel %vm3128_vm3, %v2619_v18, %v3272_v24 }
 0x275   : > { %3699 = vmatprep.subr.mxu0 %v3291_v4 }
 0x276   : > { %3700 = vmatpush3.msra.mxu0 %v4215_v52  ;;  %v2639_v52 = vrot.slane %v1532_v46, %v3984_v23  ;;  %v2623_v31 = vrot.slane %v1528_v7, %v3984_v23  ;;  %v2583_v21 = vrot.slane %v1518_v34, %v3984_v23 }
 0x277   : > { %v5051_v26 = vpop.xlane.xlu1 %926  ;;  %v1017_v50 = vpop.xlane.xlu0 %1016 }
 0x278   : > { %v1538_v20 = vmul.f32 0.0625, %v1017_v50  ;;  %v3278_v25 = vsel %vm3124_vm1, %v2643_v61, %v2639_v52  ;;  %v3274_v62 = vsel %vm3130_vm4, %v2623_v31, %v3273_v22 }
 0x279   : > { %v3279_v15 = vsel %vm3126_vm2, %v2647_v55, %v3278_v25 }
 0x27a   : > { %v2663_v14 = vrot.slane %v1538_v20, %v3984_v23  ;;  %v3280_v58 = vsel %vm3128_vm3, %v2651_v57, %v3279_v15 }
 0x27b   : > { %v960_v53 = vpop.xlane.xlu1 %959  ;;  %v930_v30 = vpop.xlane.xlu0 %929  ;;  %v3281_v9 = vsel %vm3130_vm4, %v2655_v28, %v3280_v58 }
 0x27c   : > { %v3282_v2 = vsel %vm3132_vm5, %v2659_v60, %v3281_v9  ;;  %v1519_v50 = vmul.f32 0.0625, %v960_v53  ;;  %v1509_v20 = vmul.f32 0.0625, %v930_v30 }
 0x27d   : > { %v3283_v43 = vsel %vm3134_vm6, %v2663_v14, %v3282_v2  ;;  %v1508_v14 = vmul.f32 0.0625, %v5051_v26 }
 0x27e   : > { %v2587_v28 = vrot.slane %v1519_v50, %v3984_v23  ;;  %v2547_v48 = vrot.slane %v1509_v20, %v3984_v23 }
 0x27f   : > { %v1020_v19 = vpop.xlane.xlu1 %1019  ;;  %v990_v35 = vpop.xlane.xlu0 %989  ;;  %v2543_v11 = vrot.slane %v1508_v14, %v3984_v23 }
 0x280   : > { %v1539_v36 = vmul.f32 0.0625, %v1020_v19  ;;  %v1529_v39 = vmul.f32 0.0625, %v990_v35 }
 0x282   : > { %v2667_v38 = vrot.slane %v1539_v36, %v3984_v23  ;;  %v2627_v37 = vrot.slane %v1529_v39, %v3984_v23  ;;  %v3257_v39 = vsel %vm3124_vm1, %v2547_v48, %v2543_v11 }
 0x283   : > { %v963_v42 = vpop.xlane.xlu1 %962  ;;  %v933_v44 = vpop.xlane.xlu0 %932 }
 0x284   : > { %v3284_v1 = vsel %vm3136_vm7, %v2667_v38, %v3283_v43  ;;  %v1520_v12 = vmul.f32 0.0625, %v963_v42  ;;  %v3275_v55 = vsel %vm3132_vm5, %v2627_v37, %v3274_v62  ;;  %v1510_v25 = vmul.f32 0.0625, %v933_v44  ;;  %v1658_v62 = vld [vmem:[%s5228_s1 + $0x20] sm:$0xf] }
 0x285   : > { %3701 = vmatprep.subr.mxu0 %v3284_v1 }
 0x286   : > { %3702 = vmatpush3.msra.mxu0 %v4182_v0  ;;  %v1516_v0 = vmul.f32 0.0625, %v5027_v29  ;;  %v2591_v19 = vrot.slane %v1520_v12, %v3984_v23  ;;  %v2551_v42 = vrot.slane %v1510_v25, %v3984_v23 }
 0x287   : > { %v936_v40 = vpop.xlane.xlu1 %935  ;;  %v993_v3 = vpop.xlane.xlu0 %992 }
 0x288   : > { %v1530_v63 = vmul.f32 0.0625, %v993_v3  ;;  %v2575_v29 = vrot.slane %v1516_v0, %v3984_v23  ;;  %v1511_v35 = vmul.f32 0.0625, %v936_v40  ;;  %v3258_v18 = vsel %vm3126_vm2, %v2551_v42, %v3257_v39 }
 0x28a   : > { %v2631_v59 = vrot.slane %v1530_v63, %v3984_v23  ;;  %v3264_v58 = vsel %vm3124_vm1, %v2579_v33, %v2575_v29 }
 0x28b   : > { %v996_v4 = vpop.xlane.xlu1 %995  ;;  %v966_v6 = vpop.xlane.xlu0 %965  ;;  %v3265_v9 = vsel %vm3126_vm2, %v2583_v21, %v3264_v58 }
 0x28c   : > { %v1531_v46 = vmul.f32 0.0625, %v996_v4  ;;  %v1521_v10 = vmul.f32 0.0625, %v966_v6  ;;  %v3276_v53 = vsel %vm3134_vm6, %v2631_v59, %v3275_v55  ;;  %v3266_v26 = vsel %vm3128_vm3, %v2587_v28, %v3265_v9 }
 0x28d   : > { %v3267_v45 = vsel %vm3130_vm4, %v2591_v19, %v3266_v26 }
 0x28e   : > { %v2635_v61 = vrot.slane %v1531_v46, %v3984_v23  ;;  %v2595_v30 = vrot.slane %v1521_v10, %v3984_v23 }
 0x28f   : > { %v969_v52 = vpop.xlane.xlu1 %968  ;;  %v939_v57 = vpop.xlane.xlu0 %938 }
 0x290   : > { %v1522_v60 = vmul.f32 0.0625, %v969_v52  ;;  %v3277_v15 = vsel %vm3136_vm7, %v2635_v61, %v3276_v53  ;;  %v1512_v36 = vmul.f32 0.0625, %v939_v57  ;;  %v3268_v47 = vsel %vm3132_vm5, %v2595_v30, %v3267_v45 }
 0x291   : > { %3703 = vmatprep.subr.mxu0 %v3277_v15 }
 0x292   : > { %3704 = vmatpush3.msra.mxu0 %v4149_v13  ;;  %v2599_v38 = vrot.slane %v1522_v60, %v3984_v23  ;;  %v2555_v13 = vrot.slane %v1511_v35, %v3984_v23  ;;  %v2559_v1 = vrot.slane %v1512_v36, %v3984_v23 }
 0x293   : > { %v972_v2 = vpop.xlane.xlu1 %971  ;;  %v942_v5 = vpop.xlane.xlu0 %941 }
 0x294   : > { %v1523_v44 = vmul.f32 0.0625, %v972_v2  ;;  %v1513_v43 = vmul.f32 0.0625, %v942_v5  ;;  %v3269_v17 = vsel %vm3134_vm6, %v2599_v38, %v3268_v47  ;;  %v3259_v32 = vsel %vm3128_vm3, %v2555_v13, %v3258_v18 }
 0x295   : > { %v3260_v37 = vsel %vm3130_vm4, %v2559_v1, %v3259_v32 }
 0x296   : > { %v2603_v7 = vrot.slane %v1523_v44, %v3984_v23  ;;  %v2563_v16 = vrot.slane %v1513_v43, %v3984_v23 }
 0x297   : > { %v948_v40 = vpop.xlane.xlu1 %947  ;;  %v945_v3 = vpop.xlane.xlu0 %944 }
 0x298   : > { %v1515_v63 = vmul.f32 0.0625, %v948_v40  ;;  %v1514_v31 = vmul.f32 0.0625, %v945_v3  ;;  %v3270_v49 = vsel %vm3136_vm7, %v2603_v7, %v3269_v17  ;;  %v3261_v4 = vsel %vm3132_vm5, %v2563_v16, %v3260_v37 }
 0x299   : > { %3705 = vmatprep.subr.mxu0 %v3270_v49 }
 0x29a   : > { %v2571_v24 = vrot.slane %v1515_v63, %v3984_v23  ;;  %v2567_v0 = vrot.slane %v1514_v31, %v3984_v23  ;;  %3706 = vmatpush3.msra.mxu0 %v4116_v27  ;;  %v1654_v27 = vld [vmem:[%s5228_s1] sm:$0xff] }
 0x29b   : > { %v1338_v34 = vpop.xlane.xlu1 %1337  ;;  %v1335_v59 = vpop.xlane.xlu0 %1334 }
 0x29c   : > { %v3262_v6 = vsel %vm3134_vm6, %v2567_v0, %v3261_v4  ;;  %v1645_v60 = vmul.f32 0.0625, %v1338_v34  ;;  %v1644_v15 = vmul.f32 0.0625, %v1335_v59 }
 0x29d   : > { %v3263_v22 = vsel %vm3136_vm7, %v2571_v24, %v3262_v6 }
 0x29e   : > { %3707 = vmatprep.subr.mxu0 %v3263_v22  ;;  %v3091_v36 = vrot.slane %v1645_v60, %v3984_v23  ;;  %v3087_v9 = vrot.slane %v1644_v15, %v3984_v23 }
 0x29f   : > { %v5124_v50 = vpop.xlane.xlu1 %1310  ;;  %3708 = vmatpush3.msra.mxu0 %v4083_v41  ;;  %v1341_v46 = vpop.xlane.xlu0 %1340 }
 0x2a0   : > { %3709 = vmatprep.subr.mxu0 %v4578_v51  ;;  %v1646_v14 = vmul.f32 0.0625, %v1341_v46  ;;  %v3376_v43 = vsel %vm3124_vm1, %v3091_v36, %v3087_v9  ;;  %v1636_v32 = vmul.f32 0.0625, %v5124_v50 }
 0x2a1   : > { %3710 = vmatpush3.msra.mxu0 %v4050_v56  ;;  %v1657_v56 = vld [vmem:[%s5228_s1 + $0x18] sm:$0xf] }
 0x2a2   : > { %3711 = vmatprep.subr.mxu0 %v4545_v54  ;;  %v3095_v38 = vrot.slane %v1646_v14, %v3984_v23  ;;  %v3055_v46 = vrot.slane %v1636_v32, %v3984_v23 }
 0x2a3   : > { %v1344_v12 = vpop.xlane.xlu1 %1343  ;;  %3712 = vmatpush3.msra.mxu0 %v4017_v8  ;;  %v1314_v33 = vpop.xlane.xlu0 %1313 }
 0x2a4   : > { %3495 = vmatmul.mubr.f32.vlgmr.msra.gmra.mxu0 %v1654_v27  ;;  %v1647_v58 = vmul.f32 0.0625, %v1344_v12  ;;  %v3377_v45 = vsel %vm3126_vm2, %v3095_v38, %v3376_v43  ;;  %v1637_v40 = vmul.f32 0.0625, %v1314_v33 }
 0x2a5   : > { %3499 = vmatprep.mubr.f32.mxu0 %v1658_v62 }
 0x2a6   : > { %v3099_v42 = vrot.slane %v1647_v58, %v3984_v23  ;;  %v3059_v34 = vrot.slane %v1637_v40, %v3984_v23 }
 0x2a7   : > { %v1347_v41 = vpop.xlane.xlu1 %1346  ;;  %v1317_v51 = vpop.xlane.xlu0 %1316 }
 0x2a8   : > { %3500 = vmatmul.mubr.f32.gmra.mxu0 %v1657_v56  ;;  %v1648_v30 = vmul.f32 0.0625, %v1347_v41  ;;  %v3378_v47 = vsel %vm3128_vm3, %v3099_v42, %v3377_v45  ;;  %v1638_v18 = vmul.f32 0.0625, %v1317_v51  ;;  %v3369_v33 = vsel %vm3124_vm1, %v3059_v34, %v3055_v46 }
 0x2aa   : > { %v3103_v44 = vrot.slane %v1648_v30, %v3984_v23  ;;  %v3063_v4 = vrot.slane %v1638_v18, %v3984_v23 }
 0x2ab   : > { %v1290_v61 = vpop.xlane.xlu1 %1289  ;;  %v5140_v10 = vpop.xlane.xlu0 %1286 }
 0x2ac   : > { %v3379_v16 = vsel %vm3130_vm4, %v3103_v44, %v3378_v47  ;;  %v1629_v12 = vmul.f32 0.0625, %v1290_v61  ;;  %v1628_v56 = vmul.f32 0.0625, %v5140_v10  ;;  %v3370_v51 = vsel %vm3126_vm2, %v3063_v4, %v3369_v33 }
 0x2ae   : > { %v3027_v61 = vrot.slane %v1629_v12, %v3984_v23  ;;  %v3023_v10 = vrot.slane %v1628_v56, %v3984_v23  ;;  %v1659_v56 = vld [vmem:[%s5228_s1 + $0x28] sm:$0xf] }
 0x2af   : > { %v1350_v54 = vpop.xlane.xlu1 %1349  ;;  %v1320_v55 = vpop.xlane.xlu0 %1319 }
 0x2b0   : > { %v1649_v48 = vmul.f32 0.0625, %v1350_v54  ;;  %v1639_v37 = vmul.f32 0.0625, %v1320_v55  ;;  %v3362_v44 = vsel %vm3124_vm1, %v3027_v61, %v3023_v10 }
 0x2b2   : > { %v3107_v11 = vrot.slane %v1649_v48, %v3984_v23  ;;  %v3067_v27 = vrot.slane %v1639_v37, %v3984_v23 }
 0x2b3   : > { %v1362_v29 = vpop.xlane.xlu1 %1361  ;;  %v1359_v21 = vpop.xlane.xlu0 %1358 }
 0x2b4   : > { %v1653_v20 = vmul.f32 0.0625, %v1362_v29  ;;  %v1652_v52 = vmul.f32 0.0625, %v1359_v21  ;;  %v3380_v17 = vsel %vm3132_vm5, %v3107_v11, %v3379_v16 }
 0x2b6   : > { %v3123_v8 = vrot.slane %v1653_v20, %v3984_v23  ;;  %v3119_v57 = vrot.slane %v1652_v52, %v3984_v23  ;;  %v3371_v20 = vsel %vm3128_vm3, %v3067_v27, %v3370_v51 }
 0x2b7   : > { %v1323_v53 = vpop.xlane.xlu1 %1322  ;;  %v1293_v28 = vpop.xlane.xlu0 %1292 }
 0x2b8   : > { %v3383_v25 = vsel %vm3124_vm1, %v3123_v8, %v3119_v57  ;;  %v1640_v0 = vmul.f32 0.0625, %v1323_v53  ;;  %v1630_v54 = vmul.f32 0.0625, %v1293_v28 }
 0x2b9   : > { %3726 = vmatprep.subr.msk.mxu1 %vm3427_vm9, %v3383_v25 }
 0x2ba   : > { %3727 = vmatpush3.msk.msra.mxu1 %vm3427_vm9, %v3383_v25  ;;  %v3071_v50 = vrot.slane %v1640_v0, %v3984_v23  ;;  %v3031_v15 = vrot.slane %v1630_v54, %v3984_v23 }
 0x2bb   : > { %v5145_v19 = vpop.xlane.xlu1 %1262  ;;  %v1353_v35 = vpop.xlane.xlu0 %1352 }
 0x2bc   : > { %v1650_v2 = vmul.f32 0.0625, %v1353_v35  ;;  %v3372_v57 = vsel %vm3130_vm4, %v3071_v50, %v3371_v20  ;;  %v3363_v11 = vsel %vm3126_vm2, %v3031_v15, %v3362_v44 }
 0x2be   : > { %v3111_v13 = vrot.slane %v1650_v2, %v3984_v23  ;;  %v1620_v2 = vmul.f32 0.0625, %v5145_v19 }
 0x2bf   : > { %v1296_v5 = vpop.xlane.xlu1 %1295  ;;  %v1266_v26 = vpop.xlane.xlu0 %1265 }
 0x2c0   : > { %v3381_v49 = vsel %vm3134_vm6, %v3111_v13, %v3380_v17  ;;  %v1631_v52 = vmul.f32 0.0625, %v1296_v5  ;;  %v1621_v14 = vmul.f32 0.0625, %v1266_v26  ;;  %v2991_v40 = vrot.slane %v1620_v2, %v3984_v23 }
 0x2c2   : > { %v3035_v36 = vrot.slane %v1631_v52, %v3984_v23  ;;  %v2995_v45 = vrot.slane %v1621_v14, %v3984_v23 }
 0x2c3   : > { %v1356_v1 = vpop.xlane.xlu1 %1355  ;;  %v1326_v7 = vpop.xlane.xlu0 %1325 }
 0x2c4   : > { %v1651_v39 = vmul.f32 0.0625, %v1356_v1  ;;  %v1641_v59 = vmul.f32 0.0625, %v1326_v7  ;;  %v3364_v19 = vsel %vm3128_vm3, %v3035_v36, %v3363_v11 }
 0x2c6   : > { %v3115_v3 = vrot.slane %v1651_v39, %v3984_v23  ;;  %v3075_v41 = vrot.slane %v1641_v59, %v3984_v23 }
 0x2c7   : > { %v1299_v63 = vpop.xlane.xlu1 %1298  ;;  %v1269_v31 = vpop.xlane.xlu0 %1268 }
 0x2c8   : > { %v3382_v24 = vsel %vm3136_vm7, %v3115_v3, %v3381_v49  ;;  %v1632_v53 = vmul.f32 0.0625, %v1299_v63  ;;  %v3373_v28 = vsel %vm3132_vm5, %v3075_v41, %v3372_v57  ;;  %v1622_v9 = vmul.f32 0.0625, %v1269_v31 }
 0x2c9   : > { %3728 = vmatprep.subr.mxu1 %v3382_v24  ;;  %v3355_v49 = vsel %vm3124_vm1, %v2995_v45, %v2991_v40 }
 0x2ca   : > { %3729 = vmatpush3.msra.mxu1 %v3382_v24  ;;  %v3039_v5 = vrot.slane %v1632_v53, %v3984_v23  ;;  %v2999_v47 = vrot.slane %v1622_v9, %v3984_v23 }
 0x2cb   : > { %v1272_v6 = vpop.xlane.xlu1 %1271  ;;  %v1329_v22 = vpop.xlane.xlu0 %1328 }
 0x2cc   : > { %v1642_v62 = vmul.f32 0.0625, %v1329_v22  ;;  %v1623_v42 = vmul.f32 0.0625, %v1272_v6  ;;  %v3365_v3 = vsel %vm3130_vm4, %v3039_v5, %v3364_v19  ;;  %v3356_v34 = vsel %vm3126_vm2, %v2999_v47, %v3355_v49 }
 0x2ce   : > { %v3079_v55 = vrot.slane %v1642_v62, %v3984_v23  ;;  %v3003_v17 = vrot.slane %v1623_v42, %v3984_v23 }
 0x2cf   : > { %v1332_v29 = vpop.xlane.xlu1 %1331  ;;  %v1302_v21 = vpop.xlane.xlu0 %1301 }
 0x2d0   : > { %v1643_v8 = vmul.f32 0.0625, %v1332_v29  ;;  %v1633_v60 = vmul.f32 0.0625, %v1302_v21  ;;  %v3374_v30 = vsel %vm3134_vm6, %v3079_v55, %v3373_v28  ;;  %v3357_v22 = vsel %vm3128_vm3, %v3003_v17, %v3356_v34 }
 0x2d2   : > { %v3083_v25 = vrot.slane %v1643_v8, %v3984_v23  ;;  %v3043_v26 = vrot.slane %v1633_v60, %v3984_v23 }
 0x2d3   : > { %v1305_v35 = vpop.xlane.xlu1 %1304  ;;  %v1275_v58 = vpop.xlane.xlu0 %1274 }
 0x2d4   : > { %v1634_v48 = vmul.f32 0.0625, %v1305_v35  ;;  %v3375_v38 = vsel %vm3136_vm7, %v3083_v25, %v3374_v30  ;;  %v1624_v43 = vmul.f32 0.0625, %v1275_v58  ;;  %v3366_v31 = vsel %vm3132_vm5, %v3043_v26, %v3365_v3 }
 0x2d5   : > { %3730 = vmatprep.subr.mxu1 %v3375_v38 }
 0x2d6   : > { %3731 = vmatpush3.msra.mxu1 %v3375_v38  ;;  %v3047_v13 = vrot.slane %v1634_v48, %v3984_v23  ;;  %v3007_v18 = vrot.slane %v1624_v43, %v3984_v23 }
 0x2d7   : > { %v1308_v1 = vpop.xlane.xlu1 %1307  ;;  %v1278_v7 = vpop.xlane.xlu0 %1277 }
 0x2d8   : > { %v1635_v39 = vmul.f32 0.0625, %v1308_v1  ;;  %v1625_v16 = vmul.f32 0.0625, %v1278_v7  ;;  %v3367_v0 = vsel %vm3134_vm6, %v3047_v13, %v3366_v31  ;;  %v3358_v46 = vsel %vm3130_vm4, %v3007_v18, %v3357_v22 }
 0x2da   : > { %v3051_v63 = vrot.slane %v1635_v39, %v3984_v23  ;;  %v3011_v32 = vrot.slane %v1625_v16, %v3984_v23 }
 0x2db   : > { %v1281_v37 = vpop.xlane.xlu0 %1280  ;;  %v1284_v24 = vpop.xlane.xlu1 %1283 }
 0x2dc   : > { %v1626_v59 = vmul.f32 0.0625, %v1281_v37  ;;  %v1627_v4 = vmul.f32 0.0625, %v1284_v24  ;;  %v3368_v6 = vsel %vm3136_vm7, %v3051_v63, %v3367_v0  ;;  %v3359_v12 = vsel %vm3132_vm5, %v3011_v32, %v3358_v46 }
 0x2dd   : > { %3732 = vmatprep.subr.mxu1 %v3368_v6 }
 0x2de   : > { %v3015_v27 = vrot.slane %v1626_v59, %v3984_v23  ;;  %v3019_v62 = vrot.slane %v1627_v4, %v3984_v23  ;;  %3733 = vmatpush3.msra.mxu1 %v3368_v6 }
 0x2df   : > { %v1670_v29 = vpop.permute.xlu1 %1669 }
 0x2e0   : > { %v3360_v50 = vsel %vm3134_vm6, %v3015_v27, %v3359_v12 }
 0x2e1   : > { %v3361_v33 = vsel %vm3136_vm7, %v3019_v62, %v3360_v50 }
 0x2e2   : > { %3734 = vmatprep.subr.mxu1 %v3361_v33 }
 0x2e3   : > { %3735 = vmatpush3.msra.mxu1 %v3361_v33  ;;  %v1665_v52 = vpop.permute.xlu0 %1664 }
 0x2e4   : > { %3737 = vmatmul.mubr.msk.f32.vlgmr.msra.gmra.mxu1 %vm3420_vm8, %v1659_v56 }
 0x364   : > { %v3713_v41 = vpop.f32.mrf.mxu0 }
 0x366   : > { %v3714_v51 = vpop.f32.mrf.mxu0 }
 0x367   : > { %v3715_v21 = vadd.f32 %v3714_v51, %v3713_v41 }
 0x368   : > { %v3716_v54 = vpop.f32.mrf.mxu0 }
 0x369   : > { %v3497_v61 = vadd.f32 %v3715_v21, %v1665_v52 }
 0x36a   : > { %v3717_v23 = vpop.f32.mrf.mxu0 }
 0x36b   : > { %v3718_v55 = vadd.f32 %v3717_v23, %v3716_v54 }
 0x36d   : > { %v3502_v20 = vadd.f32 %v3718_v55, %v1670_v29 }
 0x3a4   : > { %v3738_v8 = vpop.f32.mrf.mxu1 }
 0x3a5   : > { %v3577_v57 = vadd.f32 %v3738_v8, %v3502_v20 }
 0x3a6   : > { %v3571_v53 = vpop.f32.mrf.mxu1 }
 0x3a7   : > { %3583 = vst.msk [vmem:[%s201_s16 + $0x8] sm:$0xf] %vm3582_vm10, %v3577_v57  ;;  %v3572_v10 = vadd.f32 %v3571_v53, %v3497_v61 }
 0x3a9   : > { %3581 = vst.msk [vmem:[%s201_s16] sm:$0xff] %vm3580_vm11, %v3572_v10 }
 0x3aa PF: > { %s13_s14 = sadd.s32 1, %s3789_s14   ;;  %s5231_s12 = smov %s3785_s13 }
 0x3ab   : > { %p10_p5 = scmp.ge.s32.totalorder %s13_s14, 4   ;;  %s5232_s13 = smov %s5234_s15 }
 0x3ad   :  { %12 = sbr.rel (!%p10_p5) target bundleno = 2 (0x2), region = 62 }

</bundles_post_ra>
